<compile_context>
chip_gen: v7x
topology: tpu7x:2x2x1
jax: 0.10.0
libtpu: 0.0.40
codegen_flags: <defaults>
</compile_context>

<pallas_src>
import functools
import math

import numpy as np
import jax
import jax.numpy as jnp
from jax.experimental import pallas as pl
from jax.experimental.pallas import tpu as pltpu

LANE = 128      # TPU lane width -> output / N padding target
SUBLANE = 8     # batch-tile alignment


def _fused_textcnn_kernel(x_ref, w_ref, b_ref, mask_ref, o_ref, *, Kmax, P):
    """One batch tile of the fused text-CNN (all kernel sizes at once).

    x_ref:    (B_tile, L_pad, D)   bf16  zero-padded embedded tokens
    w_ref:    (Kmax, D, Co_pad)    bf16  per-shift weights, all Ks concatenated
                                         along Co, zero-padded along K and Co
    b_ref:    (1, Co_pad)          f32   concatenated conv biases (zero-padded)
    mask_ref: (P, Co_pad)          f32   0 where the conv position is valid for
                                         that column's kernel size, else -1e30
    o_ref:    (B_tile, Co_pad)     f32   pooled features
    """
    x = x_ref[...]                                   # (B_tile, L_pad, D)
    Bt = x.shape[0]
    Co_pad = b_ref.shape[-1]

    # Conv(K, D) over the sequence == sum of K shifted (., D) @ (D, Co) matmuls.
    # The einsum flattens (B_tile, P) into the MXU M dim; accumulate in f32.
    acc = jnp.zeros((Bt, P, Co_pad), jnp.float32)
    for k in range(Kmax):                            # static unroll (Kmax small)
        acc = acc + jnp.einsum(
            'bpd,dc->bpc', x[:, k:k + P, :], w_ref[k],
            preferred_element_type=jnp.float32)

    # Mask conv positions that are out of range for each column's kernel size,
    # then take max over time.  Bias + ReLU are monotone, so they are applied
    # once per (batch, channel) after the max (== PyTorch relu-then-maxpool).
    acc = acc + mask_ref[...][None, :, :]
    pooled = jnp.max(acc, axis=1)                    # (B_tile, Co_pad)
    o_ref[...] = jnp.maximum(pooled + b_ref[...], 0.0)


def cnn_forward(token_ids, embeddings, conv_weights, conv_biases,
                *, b_tile=SUBLANE, compute_dtype=jnp.bfloat16):
    """Replicates CNN.forward.

    token_ids:    (B, L) int32
    embeddings:   (V, D) f32 frozen embedding table
    conv_weights: list of (K_i, D, Co) f32   (PyTorch (Co,1,K,D) transposed)
    conv_biases:  list of (Co,) f32
    returns:      (B, Co * len(Ks)) f32
    """
    B, L = token_ids.shape
    V, D = embeddings.shape
    Ks = [int(w.shape[0]) for w in conv_weights]
    Co = int(conv_weights[0].shape[-1])
    n_groups = len(Ks)
    Co_total = Co * n_groups
    Kmax, Kmin = max(Ks), min(Ks)
    assert L >= Kmax, f"sequence length {L} must be >= max kernel size {Kmax}"

    P = L - Kmin + 1                 # conv positions computed (longest group)
    L_pad = P + Kmax - 1             # = L + Kmax - Kmin  (zero pad at the end)
    Co_pad = max(LANE, math.ceil(Co_total / LANE) * LANE)
    B_pad = math.ceil(B / b_tile) * b_tile

    # ---- Pack weights / bias / validity mask (tiny, done once) -------------
    w_all = jnp.zeros((Kmax, D, Co_pad), jnp.float32)
    b_all = jnp.zeros((1, Co_pad), jnp.float32)
    for i, (K, w, b) in enumerate(zip(Ks, conv_weights, conv_biases)):
        w_all = w_all.at[:K, :, i * Co:(i + 1) * Co].set(w.astype(jnp.float32))
        b_all = b_all.at[0, i * Co:(i + 1) * Co].set(b.astype(jnp.float32))
    w_all = w_all.astype(compute_dtype)

    mask_np = np.zeros((P, Co_pad), np.float32)
    for i, K in enumerate(Ks):
        valid = L - K + 1            # valid conv output positions for this K
        mask_np[valid:, i * Co:(i + 1) * Co] = -1e30
    mask = jnp.asarray(mask_np)

    # ---- Embedding lookup (plain JAX gather) + pad to tile-friendly shape --
    x_emb = jnp.take(embeddings, token_ids, axis=0).astype(compute_dtype)
    x_pad = jnp.zeros((B_pad, L_pad, D), compute_dtype)
    x_pad = x_pad.at[:B, :L, :].set(x_emb)

    # ---- Single fused pallas_call, gridded over the batch -------------------
    kern = functools.partial(_fused_textcnn_kernel, Kmax=Kmax, P=P)
    out_padded = pl.pallas_call(
        kern,
        out_shape=jax.ShapeDtypeStruct((B_pad, Co_pad), jnp.float32),
        grid_spec=pltpu.PrefetchScalarGridSpec(
            num_scalar_prefetch=0,
            grid=(B_pad // b_tile,),
            in_specs=[
                pl.BlockSpec((b_tile, L_pad, D), lambda i: (i, 0, 0)),
                pl.BlockSpec((Kmax, D, Co_pad), lambda i: (0, 0, 0)),
                pl.BlockSpec((1, Co_pad), lambda i: (0, 0)),
                pl.BlockSpec((P, Co_pad), lambda i: (0, 0)),
            ],
            out_specs=pl.BlockSpec((b_tile, Co_pad), lambda i: (i, 0)),
        ),
        compiler_params=pltpu.CompilerParams(
            dimension_semantics=("parallel",)),
    )(x_pad, w_all, b_all, mask)

    return out_padded[:B, :Co_total]


if __name__ == "__main__":
    # Small synthetic config matching the module's __init__ semantics:
    #   args.embed_num=V, args.embed_dim=D, args.kernel_num=Co,
    #   args.kernel_sizes=Ks, args.static=True (frozen embedding).
    B, L = 2, 16           # batch, sequence length
    V, D = 50, 32          # vocab size, embedding dim
    Co = 8                 # kernel_num
    Ks = (3, 4, 5)         # kernel_sizes

    key = jax.random.PRNGKey(0)
    k_emb, k_tok, *k_ws = jax.random.split(key, 2 + 2 * len(Ks))

    embeddings = jax.random.normal(k_emb, (V, D), dtype=jnp.float32) * 0.1
    token_ids = jax.random.randint(k_tok, (B, L), 0, V, dtype=jnp.int32)

    conv_weights, conv_biases = [], []
    for i, K in enumerate(Ks):
        kw, kb = k_ws[2 * i], k_ws[2 * i + 1]
        conv_weights.append(
            jax.random.normal(kw, (K, D, Co), dtype=jnp.float32) * 0.05)
        conv_biases.append(
            jax.random.normal(kb, (Co,), dtype=jnp.float32) * 0.05)

    out = cnn_forward(token_ids, embeddings, conv_weights, conv_biases)
    out = jax.block_until_ready(out)

    assert out.shape == (B, Co * len(Ks)), out.shape
    assert out.dtype == jnp.float32

    # Reference in plain JAX using the SAME bf16-cast inputs the kernel
    # consumes (f32 accumulation), with PyTorch op order:
    #   conv -> +bias -> ReLU -> max_pool1d over time -> concat.
    x_bf = jnp.take(embeddings, token_ids, axis=0).astype(jnp.bfloat16)
    refs = []
    for w, b, K in zip(conv_weights, conv_biases, Ks):
        Lo = L - K + 1
        acc = jnp.zeros((B, Lo, Co), jnp.float32)
        wb = w.astype(jnp.bfloat16)
        for k in range(K):
            acc = acc + jnp.einsum('bld,dc->blc', x_bf[:, k:k + Lo, :], wb[k],
                                   preferred_element_type=jnp.float32)
        refs.append(jnp.max(jnp.maximum(acc + b[None, None, :], 0.0), axis=1))
    ref = jnp.concatenate(refs, axis=1)

    max_err = float(jnp.max(jnp.abs(out - ref)))
    assert jnp.allclose(out, ref, atol=1e-3, rtol=1e-3), max_err

    print("KERNEL_OK")
</pallas_src>

<mosaic_0001>
module attributes {stable_mosaic.version = 11 : i64} {
  func.func @_fused_textcnn_kernel(%arg0: i32, %arg1: memref<8x18x32xbf16, #tpu.memory_space<vmem>>, %arg2: memref<5x32x128xbf16, #tpu.memory_space<vmem>>, %arg3: memref<1x128xf32, #tpu.memory_space<vmem>>, %arg4: memref<14x128xf32, #tpu.memory_space<vmem>>, %arg5: memref<8x128xf32, #tpu.memory_space<vmem>>) attributes {dimension_semantics = [#tpu.dimension_semantics<parallel>], iteration_bounds = array<i64: 1>, scalar_prefetch = 0 : i64, scratch_operands = 0 : i64, tpu.core_type = #tpu.core_type<tc>, window_params = [{transform_indices = @transform_0, window_bounds = array<i64: 8, 18, 32>}, {pipeline_mode = #tpu.pipeline_mode<synchronous>, transform_indices = @transform_1, window_bounds = array<i64: 5, 32, 128>}, {pipeline_mode = #tpu.pipeline_mode<synchronous>, transform_indices = @transform_2, window_bounds = array<i64: 1, 128>}, {pipeline_mode = #tpu.pipeline_mode<synchronous>, transform_indices = @transform_3, window_bounds = array<i64: 14, 128>}, {transform_indices = @transform_4, window_bounds = array<i64: 8, 128>}]} {
    %c0 = arith.constant 0 : index
    %c0_0 = arith.constant 0 : index
    %c0_1 = arith.constant 0 : index
    %0 = vector.load %arg1[%c0, %c0_0, %c0_1] : memref<8x18x32xbf16, #tpu.memory_space<vmem>>, vector<8x18x32xbf16>
    %cst = arith.constant 0.000000e+00 : f32
    %1 = vector.broadcast %cst : f32 to vector<8x14x128xf32>
    %2 = vector.extract_strided_slice %0 {offsets = [0, 0, 0], sizes = [8, 14, 32], strides = [1, 1, 1]} : vector<8x18x32xbf16> to vector<8x14x32xbf16>
    %c0_2 = arith.constant 0 : index
    %c0_3 = arith.constant 0 : index
    %c0_4 = arith.constant 0 : index
    %3 = vector.load %arg2[%c0_2, %c0_3, %c0_4] : memref<5x32x128xbf16, #tpu.memory_space<vmem>>, vector<1x32x128xbf16>
    %4 = vector.shape_cast %3 : vector<1x32x128xbf16> to vector<32x128xbf16>
    "tpu.trace_start"() <{level = 10 : i32, message = "bpd,dc->bpc"}> : () -> ()
    %cst_5 = arith.constant dense<0.000000e+00> : vector<8x14x128xf32>
    %5 = tpu.matmul %2, %4, %cst_5 {dimension_numbers = #tpu.dot_dimension_numbers<[2], [0], [0, 1], [1], [0, 0, 0, 1, 1, 1], [], []>} : vector<8x14x32xbf16>, vector<32x128xbf16>, vector<8x14x128xf32> -> vector<8x14x128xf32>
    "tpu.trace_stop"() : () -> ()
    %6 = arith.addf %1, %5 : vector<8x14x128xf32>
    %7 = vector.extract_strided_slice %0 {offsets = [0, 1, 0], sizes = [8, 14, 32], strides = [1, 1, 1]} : vector<8x18x32xbf16> to vector<8x14x32xbf16>
    %c1 = arith.constant 1 : index
    %c0_6 = arith.constant 0 : index
    %c0_7 = arith.constant 0 : index
    %8 = vector.load %arg2[%c1, %c0_6, %c0_7] : memref<5x32x128xbf16, #tpu.memory_space<vmem>>, vector<1x32x128xbf16>
    %9 = vector.shape_cast %8 : vector<1x32x128xbf16> to vector<32x128xbf16>
    "tpu.trace_start"() <{level = 10 : i32, message = "bpd,dc->bpc"}> : () -> ()
    %cst_8 = arith.constant dense<0.000000e+00> : vector<8x14x128xf32>
    %10 = tpu.matmul %7, %9, %cst_8 {dimension_numbers = #tpu.dot_dimension_numbers<[2], [0], [0, 1], [1], [0, 0, 0, 1, 1, 1], [], []>} : vector<8x14x32xbf16>, vector<32x128xbf16>, vector<8x14x128xf32> -> vector<8x14x128xf32>
    "tpu.trace_stop"() : () -> ()
    %11 = arith.addf %6, %10 : vector<8x14x128xf32>
    %12 = vector.extract_strided_slice %0 {offsets = [0, 2, 0], sizes = [8, 14, 32], strides = [1, 1, 1]} : vector<8x18x32xbf16> to vector<8x14x32xbf16>
    %c2 = arith.constant 2 : index
    %c0_9 = arith.constant 0 : index
    %c0_10 = arith.constant 0 : index
    %13 = vector.load %arg2[%c2, %c0_9, %c0_10] : memref<5x32x128xbf16, #tpu.memory_space<vmem>>, vector<1x32x128xbf16>
    %14 = vector.shape_cast %13 : vector<1x32x128xbf16> to vector<32x128xbf16>
    "tpu.trace_start"() <{level = 10 : i32, message = "bpd,dc->bpc"}> : () -> ()
    %cst_11 = arith.constant dense<0.000000e+00> : vector<8x14x128xf32>
    %15 = tpu.matmul %12, %14, %cst_11 {dimension_numbers = #tpu.dot_dimension_numbers<[2], [0], [0, 1], [1], [0, 0, 0, 1, 1, 1], [], []>} : vector<8x14x32xbf16>, vector<32x128xbf16>, vector<8x14x128xf32> -> vector<8x14x128xf32>
    "tpu.trace_stop"() : () -> ()
    %16 = arith.addf %11, %15 : vector<8x14x128xf32>
    %17 = vector.extract_strided_slice %0 {offsets = [0, 3, 0], sizes = [8, 14, 32], strides = [1, 1, 1]} : vector<8x18x32xbf16> to vector<8x14x32xbf16>
    %c3 = arith.constant 3 : index
    %c0_12 = arith.constant 0 : index
    %c0_13 = arith.constant 0 : index
    %18 = vector.load %arg2[%c3, %c0_12, %c0_13] : memref<5x32x128xbf16, #tpu.memory_space<vmem>>, vector<1x32x128xbf16>
    %19 = vector.shape_cast %18 : vector<1x32x128xbf16> to vector<32x128xbf16>
    "tpu.trace_start"() <{level = 10 : i32, message = "bpd,dc->bpc"}> : () -> ()
    %cst_14 = arith.constant dense<0.000000e+00> : vector<8x14x128xf32>
    %20 = tpu.matmul %17, %19, %cst_14 {dimension_numbers = #tpu.dot_dimension_numbers<[2], [0], [0, 1], [1], [0, 0, 0, 1, 1, 1], [], []>} : vector<8x14x32xbf16>, vector<32x128xbf16>, vector<8x14x128xf32> -> vector<8x14x128xf32>
    "tpu.trace_stop"() : () -> ()
    %21 = arith.addf %16, %20 : vector<8x14x128xf32>
    %22 = vector.extract_strided_slice %0 {offsets = [0, 4, 0], sizes = [8, 14, 32], strides = [1, 1, 1]} : vector<8x18x32xbf16> to vector<8x14x32xbf16>
    %c4 = arith.constant 4 : index
    %c0_15 = arith.constant 0 : index
    %c0_16 = arith.constant 0 : index
    %23 = vector.load %arg2[%c4, %c0_15, %c0_16] : memref<5x32x128xbf16, #tpu.memory_space<vmem>>, vector<1x32x128xbf16>
    %24 = vector.shape_cast %23 : vector<1x32x128xbf16> to vector<32x128xbf16>
    "tpu.trace_start"() <{level = 10 : i32, message = "bpd,dc->bpc"}> : () -> ()
    %cst_17 = arith.constant dense<0.000000e+00> : vector<8x14x128xf32>
    %25 = tpu.matmul %22, %24, %cst_17 {dimension_numbers = #tpu.dot_dimension_numbers<[2], [0], [0, 1], [1], [0, 0, 0, 1, 1, 1], [], []>} : vector<8x14x32xbf16>, vector<32x128xbf16>, vector<8x14x128xf32> -> vector<8x14x128xf32>
    "tpu.trace_stop"() : () -> ()
    %26 = arith.addf %21, %25 : vector<8x14x128xf32>
    %c0_18 = arith.constant 0 : index
    %c0_19 = arith.constant 0 : index
    %27 = vector.load %arg4[%c0_18, %c0_19] : memref<14x128xf32, #tpu.memory_space<vmem>>, vector<14x128xf32>
    %28 = vector.shape_cast %27 : vector<14x128xf32> to vector<1x14x128xf32>
    %29 = vector.broadcast %28 : vector<1x14x128xf32> to vector<8x14x128xf32>
    %30 = arith.addf %26, %29 : vector<8x14x128xf32>
    %cst_20 = arith.constant dense<0xFF800000> : vector<8x128xf32>
    %31 = vector.multi_reduction <maximumf>, %30, %cst_20 [1] : vector<8x14x128xf32> to vector<8x128xf32>
    %c0_21 = arith.constant 0 : index
    %c0_22 = arith.constant 0 : index
    %32 = vector.load %arg3[%c0_21, %c0_22] : memref<1x128xf32, #tpu.memory_space<vmem>>, vector<1x128xf32>
    %33 = vector.broadcast %32 : vector<1x128xf32> to vector<8x128xf32>
    %34 = arith.addf %31, %33 : vector<8x128xf32>
    %cst_23 = arith.constant 0.000000e+00 : f32
    %35 = vector.broadcast %cst_23 : f32 to vector<8x128xf32>
    %36 = arith.maximumf %34, %35 : vector<8x128xf32>
    %c0_24 = arith.constant 0 : index
    %c0_25 = arith.constant 0 : index
    %37 = vector.load %arg5[%c0_24, %c0_25] : memref<8x128xf32, #tpu.memory_space<vmem>>, vector<8x128xf32>
    tpu.vector_store %arg5[%c0_24, %c0_25], %36 {strides = array<i32>} : memref<8x128xf32, #tpu.memory_space<vmem>>, vector<8x128xf32>,
    return
  }
  func.func @transform_0(%arg0: i32) -> (i32, i32, i32) {
    %c0_i32 = arith.constant 0 : i32
    %c0_i32_0 = arith.constant 0 : i32
    %c0_i32_1 = arith.constant 0 : i32
    return %arg0, %c0_i32, %c0_i32_0 : i32, i32, i32
  }
  func.func @transform_1(%arg0: i32) -> (i32, i32, i32) {
    %c0_i32 = arith.constant 0 : i32
    %c0_i32_0 = arith.constant 0 : i32
    %c0_i32_1 = arith.constant 0 : i32
    %c0_i32_2 = arith.constant 0 : i32
    return %c0_i32, %c0_i32_0, %c0_i32_1 : i32, i32, i32
  }
  func.func @transform_2(%arg0: i32) -> (i32, i32) {
    %c0_i32 = arith.constant 0 : i32
    %c0_i32_0 = arith.constant 0 : i32
    %c0_i32_1 = arith.constant 0 : i32
    return %c0_i32, %c0_i32_0 : i32, i32
  }
  func.func @transform_3(%arg0: i32) -> (i32, i32) {
    %c0_i32 = arith.constant 0 : i32
    %c0_i32_0 = arith.constant 0 : i32
    %c0_i32_1 = arith.constant 0 : i32
    return %c0_i32, %c0_i32_0 : i32, i32
  }
  func.func @transform_4(%arg0: i32) -> (i32, i32) {
    %c0_i32 = arith.constant 0 : i32
    %c0_i32_0 = arith.constant 0 : i32
    return %arg0, %c0_i32 : i32, i32
  }
}

</mosaic_0001>

<bundles_post_ra>
// kernel: tpu_custom_call.1
= control target key start
LH: loop header
LB: loop body
LE: loop exit
PB: predicated region body
PF: predicated region fallthrough
CT: control target
= control target key end

     0   :  { %v79_v1 = vlaneseq  ;;  %v7822_v2 = vmov 0.0   ;;  %v5728_v6 = vmov 1966171168   ;;  %vm5729_vm0 = vmmov 0   ;;  %s7817_s0 = inlined_call_operand.vmem [shape: bf16[8,18,32], index: 0, kind: input, shape index: {}]   ;;  %s7818_s1 = inlined_call_operand.vmem [shape: bf16[5,32,128], index: 1, kind: input, shape index: {}]   ;;  %s7819_s2 = inlined_call_operand.vmem [shape: f32[1,128], index: 2, kind: input, shape index: {}]   ;;  %s7820_s3 = inlined_call_operand.vmem [shape: f32[14,128], index: 3, kind: input, shape index: {}]   ;;  %s7821_s4 = inlined_call_operand.hbm [shape: f32[8,128], index: 4, kind: output, shape index: {}]  }
   0x1   :  { %v5691_v0 = vld [vmem:[%s7818_s1 + $0x10] sm:$0xff]   ;;  %5500 = vmatprep.subr.bf16.mxu0 %v7822_v2  ;;  %5660 = vmatprep.subr.bf16.mxu1 %v7822_v2  ;;  %v5692_v3 = vld [vmem:[%s7818_s1 + $0x18] sm:$0xff]   ;;  %v5293_v4 = vld.sshfl [vmem:[%s7817_s0] sm:$0x33 pattern:$0x75316420]  ;;  %v77_v7 = vunpack.c.l.s4 %v5728_v6 }
   0x2   :  { %5501 = vmatpush3.bf16.msra.mxu0 %v5691_v0  ;;  %5662 = vmatpush3.bf16.msra.mxu1 %v5691_v0  ;;  %v5294_v5 = vld.sshfl [vmem:[%s7817_s0 + $0x4] sm:$0x33 pattern:$0x75316420]  ;;  %v5773_v8 = vshrl.u32 %v79_v1, 7  ;;  %v75_v10 = vcombine.high %v5293_v4, %v5293_v4 }
   0x3   :  { %5502 = vmatprep.subr.bf16.mxu0 %v7822_v2  ;;  %5661 = vmatprep.subr.bf16.mxu1 %v7822_v2  ;;  %v5295_v9 = vld.sshfl [vmem:[%s7817_s0 + $0xc] sm:$0x33 pattern:$0x75316420]  ;;  %vm452_vm1 = vsmask.f32 256  ;;  %v78_v11 = vunpack.c.0.s8 %v77_v7  ;;  %v99_v12 = vcombine.high %v5294_v5, %v5294_v5 }
   0x4   :  { %7911 = vst [vmem:[#allocation5_spill] sm:$0xff] %v5773_v8  ;;  %5504 = vmatprep.mubr.msk.bf16.mxu0 %vm5729_vm0, %v7822_v2  ;;  %5520 = vmatprep.mubr.msk.bf16.mxu1 %vm5729_vm0, %v7822_v2  ;;  %vm453_vm2 = vsmask.f32 1284  ;;  %vm455_vm3 = vsmask.f32 2312  ;;  %v123_v13 = vcombine.high %v5295_v9, %v5295_v9 }
   0x5   :  { %vm454_vm4 = vmor %vm452_vm1, %vm453_vm2  ;;  %vm457_vm5 = vsmask.f32 3340  ;;  %vm459_vm6 = vsmask.f32 4368  ;;  %v5784_v14 = vsub.s32 %v78_v11, %v5773_v8  ;;  %vm461_vm8 = vsmask.f32 5396 }
   0x6   :  { %5503 = vmatpush3.bf16.msra.mxu0 %v5692_v3  ;;  %5663 = vmatpush3.bf16.msra.mxu1 %v5692_v3  ;;  %vm456_vm7 = vmor %vm454_vm4, %vm455_vm3  ;;  %vm463_vm9 = vsmask.f32 6424  ;;  %vm465_vm11 = vsmask.f32 7452  ;;  %vm1278_vm1 = vcmask 261120  }
   0x7   :  { %5532 = vmatprep.subr.bf16.mxu0 %v7822_v2  ;;  %5564 = vmatprep.subr.bf16.mxu1 %v7822_v2  ;;  %vm458_vm10 = vmor %vm456_vm7, %vm457_vm5  ;;  %v5302_v15 = vld.sshfl [vmem:[%s7817_s0 + $0x34] sm:$0x33 pattern:$0x75316420]  ;;  %v5791_v16 = vrot.slane %v5293_v4, %v5784_v14  ;;  %v5794_v17 = vrot.slane %v75_v10, %v5784_v14  ;;  %v5797_v18 = vrot.slane %v5294_v5, %v5784_v14 }
   0x8   :  { %v5800_v19 = vrot.slane %v99_v12, %v5784_v14  ;;  %vm460_vm12 = vmor %vm458_vm10, %vm459_vm6  ;;  %v5803_v20 = vrot.slane %v5295_v9, %v5784_v14  ;;  %v5806_v21 = vrot.slane %v123_v13, %v5784_v14  ;;  %v291_v22 = vcombine.high %v5302_v15, %v5302_v15  ;;  %v5303_v57 = vld.sshfl [vmem:[%s7817_s0 + $0x3c] sm:$0x33 pattern:$0x75316420] }
   0x9   :  { %vm462_vm13 = vmor %vm460_vm12, %vm461_vm8  ;;  %v5809_v23 = vrot.slane %v5302_v15, %v5784_v14  ;;  %v5813_v24 = vcombine.high %v5791_v16, %v5791_v16  ;;  %v5817_v25 = vcombine.high %v5794_v17, %v5794_v17  ;;  %v5821_v26 = vcombine.high %v5797_v18, %v5797_v18  ;;  %v5304_v62 = vld.sshfl [vmem:[%s7817_s0 + $0x40] sm:$0x33 pattern:$0x75316420] }
   0xa   :  { %v5825_v27 = vcombine.high %v5800_v19, %v5800_v19  ;;  %vm464_vm14 = vmor %vm462_vm13, %vm463_vm9  ;;  %v468_v29 = vshrl.u32 %v5791_v16, 16  ;;  %v473_v30 = vshll.u32 %v5794_v17, 16  ;;  %v476_v31 = vshrl.u32 %v5794_v17, 16 }
   0xb   :  { %vm5829_vm15 = vmor %vm464_vm14, %vm465_vm11  ;;  %v497_v32 = vshll.u32 %v5797_v18, 16  ;;  %v481_v33 = vshll.u32 %v5813_v24, 16  ;;  %v484_v34 = vshrl.u32 %v5813_v24, 16  ;;  %v489_v35 = vshll.u32 %v5817_v25, 16 }
   0xc   :  { %v492_v36 = vshrl.u32 %v5817_v25, 16  ;;  %v475_v37 = vsel %vm5829_vm15, %v468_v29, %v473_v30  ;;  %v500_v38 = vshrl.u32 %v5797_v18, 16  ;;  %v505_v39 = vshll.u32 %v5800_v19, 16 }
   0xd   :  { %v508_v40 = vshrl.u32 %v5800_v19, 16  ;;  %v5848_v41 = vsel %vm5829_vm15, %v476_v31, %v481_v33  ;;  %v5852_v42 = vsel %vm5829_vm15, %v484_v34, %v489_v35  ;;  %v513_v44 = vshll.u32 %v5821_v26, 16 }
   0xe   :  { %v5856_v43 = vsel %vm5829_vm15, %v492_v36, %v497_v32  ;;  %v5861_v45 = vsel %vm5829_vm15, %v500_v38, %v505_v39  ;;  %v516_v46 = vshrl.u32 %v5821_v26, 16  ;;  %v521_v47 = vshll.u32 %v5825_v27, 16 }
   0xf   :  { %7914 = vst [vmem:[#allocation6_spill] sm:$0xff] %v5856_v43  ;;  %7915 = vst [vmem:[#allocation7_spill] sm:$0xff] %v5861_v45  ;;  %v525_v48 = vshrl.u32 %v5803_v20, 16  ;;  %v5868_v49 = vsel %vm5829_vm15, %v508_v40, %v513_v44  ;;  %v530_v50 = vshll.u32 %v5806_v21, 16  ;;  %v923_v51 = vcombine.low %v475_v37, %v5848_v41 }
  0x10   :  { %7916 = vst [vmem:[#allocation8_spill] sm:$0xff] %v5868_v49  ;;  %v924_v52 = vcombine.low %v5852_v42, %v5856_v43  ;;  %v5876_v53 = vsel %vm5829_vm15, %v516_v46, %v521_v47  ;;  %v925_v54 = vcombine.low %v5861_v45, %v5868_v49  ;;  %v5899_v3 = vrot.slane %v291_v22, %v5784_v14  ;;  %v5693_v47 = vld [vmem:[%s7818_s1] sm:$0xff]  }
  0x11   :  { %7917 = vst [vmem:[#allocation9_spill] sm:$0xff] %v5876_v53  ;;  %v532_v58 = vsel %vm5829_vm15, %v525_v48, %v530_v50  ;;  %v933_v59 = vrot.slane %v923_v51, %v5784_v14  ;;  %v5903_v4 = vcombine.high %v5809_v23, %v5809_v23  ;;  %v315_v6 = vcombine.high %v5303_v57, %v5303_v57 }
  0x12   :  { %v940_v60 = vrot.slane %v924_v52, %v5784_v14  ;;  %v926_v63 = vcombine.low %v5876_v53, %v532_v58  ;;  %v947_v0 = vrot.slane %v925_v54, %v5784_v14  ;;  %v5907_v7 = vrot.slane %v5303_v57, %v5784_v14 }
  0x13   :  { %v339_v9 = vcombine.high %v5304_v62, %v5304_v62  ;;  %v5912_v11 = vcombine.high %v5899_v3, %v5899_v3  ;;  %v5915_v12 = vrot.slane %v5304_v62, %v5784_v14  ;;  %v728_v13 = vshrl.u32 %v5809_v23, 16 }
  0x14   :  { %v955_v1 = vcombine.low %v933_v59, %v940_v60  ;;  %v954_v5 = vrot.slane %v926_v63, %v5784_v14  ;;  %v5919_v22 = vrot.slane %v315_v6, %v5784_v14  ;;  %v5923_v29 = vcombine.high %v5907_v7, %v5907_v7 }
  0x15   :  { %v5926_v30 = vrot.slane %v339_v9, %v5784_v14  ;;  %v733_v31 = vshll.u32 %v5899_v3, 16  ;;  %v736_v32 = vshrl.u32 %v5899_v3, 16  ;;  %v741_v33 = vshll.u32 %v5903_v4, 16 }
  0x16   :  { %v963_v10 = vrot.slane %v955_v1, %v5784_v14  ;;  %v956_v15 = vcombine.low %v947_v0, %v954_v5  ;;  %7918 = vst [vmem:[#allocation10_spill] sm:$0xff] %v5923_v29  ;;  %v744_v34 = vshrl.u32 %v5903_v4, 16  ;;  %v5935_v36 = vcombine.high %v5919_v22, %v5919_v22 }
  0x17   :  { %v749_v37 = vshll.u32 %v5912_v11, 16  ;;  %v753_v38 = vshrl.u32 %v5907_v7, 16  ;;  %v5941_v39 = vsel %vm5829_vm15, %v728_v13, %v733_v31  ;;  %v5945_v40 = vsel %vm5829_vm15, %v736_v32, %v741_v33 }
  0x18   :  { %v970_v35 = vrot.slane %v956_v15, %v5784_v14  ;;  %7919 = vst [vmem:[#allocation11_spill] sm:$0xff] %v5935_v36  ;;  %7920 = vst [vmem:[#allocation12_spill] sm:$0xff] %v5941_v39  ;;  %v758_v44 = vshll.u32 %v5919_v22, 16  ;;  %v761_v46 = vshrl.u32 %v5919_v22, 16  ;;  %v766_v51 = vshll.u32 %v5923_v29, 16 }
  0x19   :  { %7921 = vst [vmem:[#allocation13_spill] sm:$0xff] %v5945_v40  ;;  %v5954_v50 = vsel %vm5829_vm15, %v744_v34, %v749_v37  ;;  %v769_v52 = vshrl.u32 %v5923_v29, 16  ;;  %v774_v57 = vshll.u32 %v5935_v36, 16  ;;  %v777_v58 = vshrl.u32 %v5935_v36, 16 }
  0x1a   :  { %v971_v48 = vcombine.low %v963_v10, %v970_v35  ;;  %7922 = vst [vmem:[#allocation14_spill] sm:$0xff] %v5954_v50  ;;  %v760_v54 = vsel %vm5829_vm15, %v753_v38, %v758_v44  ;;  %v782_v59 = vshll.u32 %v5915_v12, 16 }
  0x1b   :  { %9 = vsyncpa [#allocation3], 0  ;;  %v5966_v60 = vsel %vm5829_vm15, %v761_v46, %v766_v51  ;;  %v785_v62 = vshrl.u32 %v5915_v12, 16  ;;  %v790_v63 = vshll.u32 %v5926_v30, 16  ;;  %v1119_v0 = vcombine.low %v5941_v39, %v5945_v40  ;;  %v5695_v15 = vld [vmem:[%s7818_s1 + $0x8] sm:$0xff]  }
  0x1c   :  { %5505 = vmatmul.mubr.msk.bf16.vlgmr.msra.gmra.mrb[0].mxu0 %vm1278_vm1, %v971_v48  ;;  %7923 = vst [vmem:[#allocation15_spill] sm:$0xff] %v5966_v60  ;;  %v5296_v1 = vld.sshfl [vmem:[%s7817_s0 + $0x10] sm:$0x33 pattern:$0x75316420]  ;;  %v5977_v5 = vsel %vm5829_vm15, %v769_v52, %v774_v57  ;;  %v5981_v6 = vsel %vm5829_vm15, %v777_v58, %v782_v59  ;;  %v1120_v9 = vcombine.low %v5954_v50, %v760_v54  ;;  %v533_v13 = vshrl.u32 %v5806_v21, 16 }
  0x1d   :  { %7924 = vst [vmem:[#allocation16_spill] sm:$0xff] %v5977_v5  ;;  %7925 = vst [vmem:[#allocation17_spill] sm:$0xff] %v5981_v6  ;;  %5533 = vmatpush3.bf16.msra.mxu0 %v5693_v47  ;;  %5508 = vmatprep.mubr.msk.bf16.mxu0 %vm5729_vm0, %v7822_v2  ;;  %v5297_v10 = vld.sshfl [vmem:[%s7817_s0 + $0x18] sm:$0x33 pattern:$0x75316420]  ;;  %v5995_v31 = vsel %vm5829_vm15, %v785_v62, %v790_v63  ;;  %v1121_v32 = vcombine.low %v5966_v60, %v5977_v5 }
  0x1e   :  { %7926 = vst [vmem:[#allocation18_spill] sm:$0xff] %v5995_v31  ;;  %v1129_v33 = vrot.slane %v1119_v0, %v5784_v14  ;;  %v6002_v34 = vcombine.high %v5803_v20, %v5803_v20  ;;  %5534 = vmatprep.subr.bf16.mxu0 %v7822_v2  ;;  %v1122_v35 = vcombine.low %v5981_v6, %v5995_v31  ;;  %v3121_v60 = vshrl.u32 %v5825_v27, 16 }
  0x1f   :  { %v1136_v37 = vrot.slane %v1120_v9, %v5784_v14  ;;  %v6010_v38 = vcombine.high %v5806_v21, %v5806_v21  ;;  %v147_v44 = vcombine.high %v5296_v1, %v5296_v1  ;;  %v1143_v46 = vrot.slane %v1121_v32, %v5784_v14 }
  0x20   :  { %v6014_v47 = vrot.slane %v5296_v1, %v5784_v14  ;;  %v171_v48 = vcombine.high %v5297_v10, %v5297_v10  ;;  %v6017_v51 = vrot.slane %v5297_v10, %v5784_v14  ;;  %v1150_v52 = vrot.slane %v1122_v35, %v5784_v14 }
  0x21   :  { %v1151_v54 = vcombine.low %v1129_v33, %v1136_v37  ;;  %v6021_v57 = vrot.slane %v147_v44, %v5784_v14  ;;  %v538_v58 = vshll.u32 %v6002_v34, 16  ;;  %5535 = vmatpush3.bf16.msra.mxu0 %v5695_v15  ;;  %v541_v0 = vshrl.u32 %v6002_v34, 16 }
  0x22   :  { %v6026_v59 = vcombine.high %v6014_v47, %v6014_v47  ;;  %v6029_v62 = vrot.slane %v171_v48, %v5784_v14  ;;  %v6033_v63 = vcombine.high %v6017_v51, %v6017_v51  ;;  %5628 = vmatprep.subr.bf16.mxu0 %v7822_v2  ;;  %v1152_v1 = vcombine.low %v1143_v46, %v1150_v52  ;;  %v5694_v46 = vld [vmem:[%s7818_s1 + $0x20] sm:$0xff]  }
  0x23   :  { %v1159_v9 = vrot.slane %v1151_v54, %v5784_v14  ;;  %v6040_v10 = vcombine.high %v6021_v57, %v6021_v57  ;;  %v6044_v15 = vsel %vm5829_vm15, %v533_v13, %v538_v58  ;;  %v546_v32 = vshll.u32 %v6010_v38, 16  ;;  %v5412_v54 = vld.sshfl [vmem:[%s7817_s0 + $0x8] sm:$0x1 pattern:$0x75316420] }
  0x24   :  { %7928 = vst [vmem:[#allocation20_spill] sm:$0xff] %v6044_v15  ;;  %v549_v33 = vshrl.u32 %v6010_v38, 16  ;;  %v554_v35 = vshll.u32 %v6014_v47, 16  ;;  %v557_v37 = vshrl.u32 %v6014_v47, 16  ;;  %v1166_v44 = vrot.slane %v1152_v1, %v5784_v14 }
  0x25   :  { %7927 = vst [vmem:[#allocation19_spill] sm:$0xff] %v6040_v10  ;;  %v562_v48 = vshll.u32 %v6021_v57, 16  ;;  %v565_v52 = vshrl.u32 %v6021_v57, 16  ;;  %v570_v13 = vshll.u32 %v6026_v59, 16  ;;  %v6062_v58 = vsel %vm5829_vm15, %v541_v0, %v546_v32 }
  0x26   :  { %7929 = vst [vmem:[#allocation21_spill] sm:$0xff] %v6062_v58  ;;  %v6066_v1 = vsel %vm5829_vm15, %v549_v33, %v554_v35  ;;  %v573_v61 = vshrl.u32 %v6026_v59, 16  ;;  %v578_v56 = vshll.u32 %v6040_v10, 16  ;;  %v1167_v55 = vcombine.low %v1159_v9, %v1166_v44 }
  0x27   :  { %7930 = vst [vmem:[#allocation22_spill] sm:$0xff] %v6066_v1  ;;  %v6072_v2 = vsel %vm5829_vm15, %v557_v37, %v562_v48  ;;  %v6076_v8 = vsel %vm5829_vm15, %v565_v52, %v570_v13  ;;  %v582_v0 = vshrl.u32 %v6017_v51, 16  ;;  %v587_v33 = vshll.u32 %v6029_v62, 16 }
  0x28   :  { %7931 = vst [vmem:[#allocation23_spill] sm:$0xff] %v6072_v2  ;;  %7932 = vst [vmem:[#allocation24_spill] sm:$0xff] %v6076_v8  ;;  %v6081_v32 = vsel %vm5829_vm15, %v573_v61, %v578_v56  ;;  %v590_v35 = vshrl.u32 %v6029_v62, 16  ;;  %v595_v9 = vshll.u32 %v6033_v63, 16  ;;  %5521 = vmatmul.mubr.msk.bf16.vlgmr.msra.gmra.mrb[0].mxu1 %vm1278_vm1, %v1167_v55  ;;  %v972_v37 = vcombine.low %v6044_v15, %v6062_v58 }
  0x29   :  { %7933 = vst [vmem:[#allocation25_spill] sm:$0xff] %v6081_v32  ;;  %v973_v44 = vcombine.low %v6066_v1, %v6072_v2  ;;  %v974_v48 = vcombine.low %v6076_v8, %v6081_v32  ;;  %v6094_v56 = vrot.slane %v5412_v54, %v5784_v14  ;;  %v5305_v61 = vld.sshfl [vmem:[%s7817_s0 + $0x48] sm:$0x33 pattern:$0x75316420]  ;;  %5565 = vmatpush3.bf16.msra.mxu1 %v5694_v46  ;;  %v7935_v52 = vmov 0.0  }
  0x2a   :  { %5524 = vmatprep.mubr.msk.bf16.mxu1 %vm5729_vm0, %v7935_v52  ;;  %v589_v55 = vsel %vm5829_vm15, %v582_v0, %v587_v33  ;;  %v6105_v13 = vsel %vm5829_vm15, %v590_v35, %v595_v9  ;;  %v5306_v54 = vld.sshfl [vmem:[%s7817_s0 + $0x4c] sm:$0x33 pattern:$0x75316420]  ;;  %v6113_v31 = vcombine.high %v5915_v12, %v5915_v12  ;;  %v982_v33 = vrot.slane %v972_v37, %v5784_v14 }
  0x2b   :  { %7934 = vst [vmem:[#allocation26_spill] sm:$0xff] %v6094_v56  ;;  %7936 = vst [vmem:[#allocation27_spill] sm:$0xff] %v6105_v13  ;;  %v5696_v46 = vld [vmem:[%s7818_s1 + $0x28] sm:$0xff]   ;;  %v975_v0 = vcombine.low %v589_v55, %v6105_v13  ;;  %v989_v35 = vrot.slane %v973_v44, %v5784_v14  ;;  %v996_v9 = vrot.slane %v974_v48, %v5784_v14  ;;  %5566 = vmatprep.subr.bf16.mxu1 %v7935_v52  ;;  %vm5253_vm2 = vcmask 1041409  }
  0x2c   :  { %7937 = vst [vmem:[#allocation28_spill] sm:$0xff] %v6113_v31  ;;  %v3126_v5 = vshll.u32 %v6094_v56, 16  ;;  %v6126_v6 = vcombine.high %v5926_v30, %v5926_v30  ;;  %v363_v40 = vcombine.high %v5305_v61, %v5305_v61  ;;  %v6129_v50 = vrot.slane %v5305_v61, %v5784_v14 }
  0x2d   :  { %v1003_v55 = vrot.slane %v975_v0, %v5784_v14  ;;  %v1004_v39 = vcombine.low %v982_v33, %v989_v35  ;;  %v387_v37 = vcombine.high %v5306_v54, %v5306_v54  ;;  %v6133_v44 = vrot.slane %v5306_v54, %v5784_v14  ;;  %5567 = vmatpush3.bf16.msra.mxu1 %v5696_v46 }
  0x2e   :  { %7938 = vst [vmem:[#allocation29_spill] sm:$0xff] %v6126_v6  ;;  %7939 = vst [vmem:[#allocation30_spill] sm:$0xff] %v6129_v50  ;;  %v6137_v48 = vsel %vm5829_vm15, %v3121_v60, %v3126_v5  ;;  %v6140_v56 = vrot.slane %v363_v40, %v5784_v14  ;;  %v6144_v32 = vcombine.high %v6129_v50, %v6129_v50  ;;  %v793_v61 = vshrl.u32 %v5926_v30, 16 }
  0x2f   :  { %7940 = vst [vmem:[#allocation31_spill] sm:$0xff] %v6133_v44  ;;  %7941 = vst [vmem:[#allocation32_spill] sm:$0xff] %v6137_v48  ;;  %v7944_v0 = vcombine.low %v5848_v41, %v5852_v42  ;;  %v1005_v33 = vcombine.low %v996_v9, %v1003_v55  ;;  %v1012_v60 = vrot.slane %v1004_v39, %v5784_v14  ;;  %5596 = vmatprep.subr.bf16.mxu1 %v7935_v52  ;;  %vm5256_vm3 = vcmask 1042434  }
  0x30   :  { %7942 = vst [vmem:[#allocation33_spill] sm:$0xff] %v6140_v56  ;;  %7943 = vst [vmem:[#allocation34_spill] sm:$0xff] %v6144_v32  ;;  %v6159_v5 = vcombine.high %v6140_v56, %v6140_v56  ;;  %v6162_v46 = vrot.slane %v387_v37, %v5784_v14  ;;  %v798_v35 = vshll.u32 %v6113_v31, 16  ;;  %v801_v41 = vshrl.u32 %v6113_v31, 16 }
  0x31   :  { %v6151_v54 = vrot.slane %v7944_v0, %v5784_v14  ;;  %v1019_v42 = vrot.slane %v1005_v33, %v5784_v14  ;;  %v6169_v39 = vcombine.high %v6133_v44, %v6133_v44  ;;  %v806_v9 = vshll.u32 %v6126_v6, 16 }
  0x32   :  { %7946 = vst [vmem:[#allocation36_spill] sm:$0xff] %v6159_v5  ;;  %7947 = vst [vmem:[#allocation37_spill] sm:$0xff] %v6162_v46  ;;  %v810_v55 = vshrl.u32 %v6129_v50, 16  ;;  %v6175_v0 = vsel %vm5829_vm15, %v793_v61, %v798_v35  ;;  %v815_v37 = vshll.u32 %v6140_v56, 16  ;;  %v818_v40 = vshrl.u32 %v6140_v56, 16 }
  0x33   :  { %7945 = vst [vmem:[#allocation35_spill] sm:$0xff] %v6151_v54  ;;  %7948 = vst [vmem:[#allocation38_spill] sm:$0xff] %v6169_v39  ;;  %v823_v13 = vshll.u32 %v6144_v32, 16  ;;  %v1020_v2 = vcombine.low %v1012_v60, %v1019_v42  ;;  %v6182_v33 = vsel %vm5829_vm15, %v801_v41, %v806_v9  ;;  %v826_v8 = vshrl.u32 %v6144_v32, 16 }
  0x34   :  { %7949 = vst [vmem:[#allocation39_spill] sm:$0xff] %v6175_v0  ;;  %7950 = vst [vmem:[#allocation40_spill] sm:$0xff] %v6182_v33  ;;  %v831_v6 = vshll.u32 %v6159_v5, 16  ;;  %v817_v58 = vsel %vm5829_vm15, %v810_v55, %v815_v37  ;;  %v834_v35 = vshrl.u32 %v6159_v5, 16  ;;  %v839_v1 = vshll.u32 %v6133_v44, 16 }
  0x35   :  { %v6190_v61 = vsel %vm5829_vm15, %v818_v40, %v823_v13  ;;  %v5298_v60 = vld.sshfl [vmem:[%s7817_s0 + $0x1c] sm:$0x33 pattern:$0x75316420]  ;;  %5509 = vmatmul.mubr.msk.bf16.gmra.mrb[4].mxu0 %vm1278_vm1, %v1020_v2  ;;  %v842_v42 = vshrl.u32 %v6133_v44, 16  ;;  %v847_v9 = vshll.u32 %v6162_v46, 16  ;;  %v1168_v37 = vcombine.low %v6175_v0, %v6182_v33 }
  0x36   :  { %7951 = vst [vmem:[#allocation41_spill] sm:$0xff] %v6190_v61  ;;  %v6200_v41 = vsel %vm5829_vm15, %v826_v8, %v831_v6  ;;  %v850_v13 = vshrl.u32 %v6162_v46, 16  ;;  %v6207_v40 = vsel %vm5829_vm15, %v834_v35, %v839_v1  ;;  %v855_v55 = vshll.u32 %v6169_v39, 16  ;;  %5512 = vmatprep.mubr.msk.bf16.mxu0 %vm5729_vm0, %v7935_v52 }
  0x37   :  { %7952 = vst [vmem:[#allocation42_spill] sm:$0xff] %v6200_v41  ;;  %7953 = vst [vmem:[#allocation43_spill] sm:$0xff] %v6207_v40  ;;  %v1169_v2 = vcombine.low %v817_v58, %v6190_v61  ;;  %v5299_v8 = vld.sshfl [vmem:[%s7817_s0 + $0x24] sm:$0x33 pattern:$0x75316420]  ;;  %v6220_v6 = vsel %vm5829_vm15, %v842_v42, %v847_v9  ;;  %v1170_v1 = vcombine.low %v6200_v41, %v6207_v40 }
  0x38   :  { %7954 = vst [vmem:[#allocation44_spill] sm:$0xff] %v6220_v6  ;;  %v6226_v35 = vcombine.high %v6029_v62, %v6029_v62  ;;  %v195_v33 = vcombine.high %v5298_v60, %v5298_v60  ;;  %v6230_v58 = vsel %vm5829_vm15, %v850_v13, %v855_v55  ;;  %v1178_v61 = vrot.slane %v1168_v37, %v5784_v14 }
  0x39   :  { %7955 = vst [vmem:[#allocation45_spill] sm:$0xff] %v6230_v58  ;;  %v1185_v0 = vrot.slane %v1169_v2, %v5784_v14  ;;  %v6235_v54 = vrot.slane %v5298_v60, %v5784_v14  ;;  %v1171_v42 = vcombine.low %v6220_v6, %v6230_v58  ;;  %v1192_v9 = vrot.slane %v1170_v1, %v5784_v14 }
  0x3a   :  { %v6241_v40 = vrot.slane %v195_v33, %v5784_v14  ;;  %v219_v41 = vcombine.high %v5299_v8, %v5299_v8  ;;  %v6248_v55 = vrot.slane %v5299_v8, %v5784_v14  ;;  %v598_v60 = vshrl.u32 %v6033_v63, 16 }
  0x3b   :  { %v1200_v10 = vcombine.low %v1178_v61, %v1185_v0  ;;  %v6245_v13 = vcombine.high %v6235_v54, %v6235_v54  ;;  %v1199_v37 = vrot.slane %v1171_v42, %v5784_v14  ;;  %v603_v0 = vshll.u32 %v6226_v35, 16 }
  0x3c   :  { %v6254_v2 = vcombine.high %v6241_v40, %v6241_v40  ;;  %v6257_v33 = vrot.slane %v219_v41, %v5784_v14  ;;  %v6263_v1 = vcombine.high %v6248_v55, %v6248_v55  ;;  %v606_v8 = vshrl.u32 %v6226_v35, 16 }
  0x3d   :  { %v1208_v61 = vrot.slane %v1200_v10, %v5784_v14  ;;  %v611_v58 = vshll.u32 %v6235_v54, 16  ;;  %v1201_v42 = vcombine.low %v1192_v9, %v1199_v37  ;;  %v6273_v41 = vsel %vm5829_vm15, %v598_v60, %v603_v0 }
  0x3e   :  { %v6269_v6 = vcombine.high %v6257_v33, %v6257_v33  ;;  %7956 = vst [vmem:[#allocation46_spill] sm:$0xff] %v6273_v41  ;;  %v614_v15 = vshrl.u32 %v6235_v54, 16  ;;  %v619_v48 = vshll.u32 %v6241_v40, 16  ;;  %v622_v53 = vshrl.u32 %v6241_v40, 16 }
  0x3f   :  { %v6278_v10 = vsel %vm5829_vm15, %v606_v8, %v611_v58  ;;  %v627_v9 = vshll.u32 %v6245_v13, 16  ;;  %v1215_v37 = vrot.slane %v1201_v42, %v5784_v14  ;;  %v630_v49 = vshrl.u32 %v6245_v13, 16  ;;  %v5307_v42 = vld.sshfl [vmem:[%s7817_s0 + $0x54] sm:$0x33 pattern:$0x75316420] }
  0x40   :  { %7957 = vst [vmem:[#allocation47_spill] sm:$0xff] %v6278_v10  ;;  %v635_v45 = vshll.u32 %v6254_v2, 16  ;;  %v639_v60 = vshrl.u32 %v6248_v55, 16  ;;  %v6289_v0 = vsel %vm5829_vm15, %v614_v15, %v619_v48  ;;  %v644_v8 = vshll.u32 %v6257_v33, 16 }
  0x41   :  { %7958 = vst [vmem:[#allocation48_spill] sm:$0xff] %v6289_v0  ;;  %v6293_v58 = vsel %vm5829_vm15, %v622_v53, %v627_v9  ;;  %v647_v43 = vshrl.u32 %v6257_v33, 16  ;;  %v1216_v50 = vcombine.low %v1208_v61, %v1215_v37  ;;  %v652_v15 = vshll.u32 %v6263_v1, 16 }
  0x42   :  { %7959 = vst [vmem:[#allocation49_spill] sm:$0xff] %v6293_v58  ;;  %v6302_v31 = vsel %vm5829_vm15, %v630_v49, %v635_v45  ;;  %v655_v48 = vshrl.u32 %v6263_v1, 16  ;;  %v646_v53 = vsel %vm5829_vm15, %v639_v60, %v644_v8  ;;  %v660_v9 = vshll.u32 %v6269_v6, 16 }
  0x43   :  { %7960 = vst [vmem:[#allocation50_spill] sm:$0xff] %v6302_v31  ;;  %v1021_v5 = vcombine.low %v6273_v41, %v6278_v10  ;;  %v1022_v44 = vcombine.low %v6289_v0, %v6293_v58  ;;  %v5308_v45 = vld.sshfl [vmem:[%s7817_s0 + $0x58] sm:$0x33 pattern:$0x75316420]  ;;  %5525 = vmatmul.mubr.msk.bf16.gmra.mrb[4].mxu1 %vm1278_vm1, %v1216_v50  ;;  %v6319_v49 = vsel %vm5829_vm15, %v647_v43, %v652_v15  ;;  %vm5259_vm4 = vcmask 1043459  }
  0x44   :  { %7961 = vst [vmem:[#allocation51_spill] sm:$0xff] %v6319_v49  ;;  %v1023_v61 = vcombine.low %v6302_v31, %v646_v53  ;;  %v6324_v37 = vcombine.high %v6162_v46, %v6162_v46  ;;  %v411_v60 = vcombine.high %v5307_v42, %v5307_v42  ;;  %5528 = vmatprep.mubr.msk.bf16.mxu1 %vm5729_vm0, %v7935_v52  ;;  %vm5262_vm5 = vcmask 1044484  }
  0x45   :  { %v6330_v8 = vsel %vm5829_vm15, %v655_v48, %v660_v9  ;;  %v1031_v50 = vrot.slane %v1021_v5, %v5784_v14  ;;  %v1038_v58 = vrot.slane %v1022_v44, %v5784_v14  ;;  %v6335_v43 = vrot.slane %v5307_v42, %v5784_v14 }
  0x46   :  { %7962 = vst [vmem:[#allocation52_spill] sm:$0xff] %v6324_v37  ;;  %7963 = vst [vmem:[#allocation53_spill] sm:$0xff] %v6330_v8  ;;  %v1024_v15 = vcombine.low %v6319_v49, %v6330_v8  ;;  %v1045_v53 = vrot.slane %v1023_v61, %v5784_v14  ;;  %v6341_v31 = vrot.slane %v411_v60, %v5784_v14  ;;  %v858_v44 = vshrl.u32 %v6169_v39, 16 }
  0x47   :  { %7964 = vst [vmem:[#allocation54_spill] sm:$0xff] %v6335_v43  ;;  %v435_v10 = vcombine.high %v5308_v45, %v5308_v45  ;;  %v1053_v0 = vcombine.low %v1031_v50, %v1038_v58  ;;  %v6345_v48 = vcombine.high %v6335_v43, %v6335_v43  ;;  %v6348_v5 = vrot.slane %v5308_v45, %v5784_v14 }
  0x48   :  { %7965 = vst [vmem:[#allocation55_spill] sm:$0xff] %v6341_v31  ;;  %v1052_v42 = vrot.slane %v1024_v15, %v5784_v14  ;;  %v6354_v9 = vcombine.high %v6341_v31, %v6341_v31  ;;  %v863_v58 = vshll.u32 %v6324_v37, 16  ;;  %v867_v45 = vshrl.u32 %v6335_v43, 16 }
  0x49   :  { %7966 = vst [vmem:[#allocation56_spill] sm:$0xff] %v6345_v48  ;;  %7967 = vst [vmem:[#allocation57_spill] sm:$0xff] %v6348_v5  ;;  %v6357_v61 = vrot.slane %v435_v10, %v5784_v14  ;;  %v1061_v60 = vrot.slane %v1053_v0, %v5784_v14  ;;  %v6363_v50 = vcombine.high %v6348_v5, %v6348_v5  ;;  %v872_v49 = vshll.u32 %v6341_v31, 16 }
  0x4a   :  { %7968 = vst [vmem:[#allocation58_spill] sm:$0xff] %v6354_v9  ;;  %v1054_v15 = vcombine.low %v1045_v53, %v1052_v42  ;;  %v6373_v10 = vsel %vm5829_vm15, %v858_v44, %v863_v58  ;;  %v875_v41 = vshrl.u32 %v6341_v31, 16  ;;  %v880_v37 = vshll.u32 %v6345_v48, 16 }
  0x4b   :  { %7969 = vst [vmem:[#allocation59_spill] sm:$0xff] %v6357_v61  ;;  %7970 = vst [vmem:[#allocation60_spill] sm:$0xff] %v6363_v50  ;;  %v6369_v8 = vcombine.high %v6357_v61, %v6357_v61  ;;  %v874_v0 = vsel %vm5829_vm15, %v867_v45, %v872_v49  ;;  %v883_v43 = vshrl.u32 %v6345_v48, 16  ;;  %v888_v46 = vshll.u32 %v6354_v9, 16 }
  0x4c   :  { %7972 = vst [vmem:[#allocation62_spill] sm:$0xff] %v6373_v10  ;;  %v1068_v53 = vrot.slane %v1054_v15, %v5784_v14  ;;  %v891_v42 = vshrl.u32 %v6354_v9, 16  ;;  %v896_v39 = vshll.u32 %v6348_v5, 16  ;;  %v899_v44 = vshrl.u32 %v6348_v5, 16 }
  0x4d   :  { %7971 = vst [vmem:[#allocation61_spill] sm:$0xff] %v6369_v8  ;;  %v6387_v58 = vsel %vm5829_vm15, %v875_v41, %v880_v37  ;;  %v6391_v49 = vsel %vm5829_vm15, %v883_v43, %v888_v46  ;;  %v904_v45 = vshll.u32 %v6357_v61, 16  ;;  %v907_v48 = vshrl.u32 %v6357_v61, 16 }
  0x4e   :  { %7973 = vst [vmem:[#allocation63_spill] sm:$0xff] %v6387_v58  ;;  %7974 = vst [vmem:[#allocation64_spill] sm:$0xff] %v6391_v49  ;;  %v5300_v15 = vld.sshfl [vmem:[%s7817_s0 + $0x28] sm:$0x33 pattern:$0x75316420]  ;;  %v1069_v9 = vcombine.low %v1061_v60, %v1068_v53  ;;  %v6400_v5 = vsel %vm5829_vm15, %v891_v42, %v896_v39  ;;  %v1217_v60 = vcombine.low %v6373_v10, %v874_v0 }
  0x4f   :  { %7975 = vst [vmem:[#allocation65_spill] sm:$0xff] %v6400_v5  ;;  %v912_v41 = vshll.u32 %v6363_v50, 16  ;;  %v915_v37 = vshrl.u32 %v6363_v50, 16  ;;  %v6409_v43 = vsel %vm5829_vm15, %v899_v44, %v904_v45  ;;  %v920_v61 = vshll.u32 %v6369_v8, 16 }
  0x50   :  { %v5301_v46 = vld.sshfl [vmem:[%s7817_s0 + $0x30] sm:$0x33 pattern:$0x75316420]  ;;  %7976 = vst [vmem:[#allocation66_spill] sm:$0xff] %v6409_v43  ;;  %v1218_v39 = vcombine.low %v6387_v58, %v6391_v49  ;;  %5513 = vmatmul.mubr.msk.bf16.gmra.mrb[8].mxu0 %vm1278_vm1, %v1069_v9  ;;  %v1219_v42 = vcombine.low %v6400_v5, %v6409_v43  ;;  %v243_v50 = vcombine.high %v5300_v15, %v5300_v15  ;;  %v663_v43 = vshrl.u32 %v6269_v6, 16 }
  0x51   :  { %v6418_v53 = vsel %vm5829_vm15, %v907_v48, %v912_v41  ;;  %v6423_v44 = vrot.slane %v5300_v15, %v5784_v14  ;;  %v6427_v45 = vsel %vm5829_vm15, %v915_v37, %v920_v61  ;;  %v1227_v0 = vrot.slane %v1217_v60, %v5784_v14  ;;  %5516 = vmatprep.mubr.msk.bf16.mxu0 %vm5729_vm0, %v7935_v52 }
  0x52   :  { %7977 = vst [vmem:[#allocation67_spill] sm:$0xff] %v6418_v53  ;;  %7978 = vst [vmem:[#allocation68_spill] sm:$0xff] %v6427_v45  ;;  %v1234_v58 = vrot.slane %v1218_v39, %v5784_v14  ;;  %v267_v48 = vcombine.high %v5301_v46, %v5301_v46  ;;  %v1220_v9 = vcombine.low %v6418_v53, %v6427_v45  ;;  %vm5265_vm6 = vcmask 1045509  }
  0x53   :  { %v1241_v41 = vrot.slane %v1219_v42, %v5784_v14  ;;  %v6437_v15 = vrot.slane %v243_v50, %v5784_v14  ;;  %v6441_v61 = vcombine.high %v6423_v44, %v6423_v44  ;;  %v6444_v60 = vrot.slane %v5301_v46, %v5784_v14 }
  0x54   :  { %v1249_v37 = vcombine.low %v1227_v0, %v1234_v58  ;;  %v6447_v39 = vrot.slane %v267_v48, %v5784_v14  ;;  %v1248_v45 = vrot.slane %v1220_v9, %v5784_v14  ;;  %v668_v50 = vshll.u32 %v6423_v44, 16 }
  0x55   :  { %v6453_v42 = vcombine.high %v6437_v15, %v6437_v15  ;;  %v671_v53 = vshrl.u32 %v6423_v44, 16  ;;  %v6460_v46 = vcombine.high %v6444_v60, %v6444_v60  ;;  %v676_v48 = vshll.u32 %v6437_v15, 16 }
  0x56   :  { %v1257_v58 = vrot.slane %v1249_v37, %v5784_v14  ;;  %v6464_v0 = vcombine.high %v6447_v39, %v6447_v39  ;;  %v1250_v9 = vcombine.low %v1241_v41, %v1248_v45  ;;  %v6469_v49 = vsel %vm5829_vm15, %v663_v43, %v668_v50 }
  0x57   :  { %7979 = vst [vmem:[#allocation69_spill] sm:$0xff] %v6453_v42  ;;  %v679_v5 = vshrl.u32 %v6437_v15, 16  ;;  %v684_v10 = vshll.u32 %v6441_v61, 16  ;;  %v6475_v37 = vsel %vm5829_vm15, %v671_v53, %v676_v48  ;;  %v687_v8 = vshrl.u32 %v6441_v61, 16 }
  0x58   :  { %v692_v31 = vshll.u32 %v6453_v42, 16  ;;  %v696_v56 = vshrl.u32 %v6444_v60, 16  ;;  %v1264_v45 = vrot.slane %v1250_v9, %v5784_v14  ;;  %v701_v41 = vshll.u32 %v6447_v39, 16 }
  0x59   :  { %v6483_v43 = vsel %vm5829_vm15, %v679_v5, %v684_v10  ;;  %v704_v50 = vshrl.u32 %v6447_v39, 16  ;;  %v709_v48 = vshll.u32 %v6460_v46, 16  ;;  %v712_v42 = vshrl.u32 %v6460_v46, 16 }
  0x5a   :  { %v6489_v53 = vsel %vm5829_vm15, %v687_v8, %v692_v31  ;;  %v717_v32 = vshll.u32 %v6464_v0, 16  ;;  %v1265_v36 = vcombine.low %v1257_v58, %v1264_v45  ;;  %v703_v9 = vsel %vm5829_vm15, %v696_v56, %v701_v41 }
  0x5b   :  { %7980 = vst [vmem:[#allocation70_spill] sm:$0xff] %v6489_v53  ;;  %v720_v5 = vshrl.u32 %v6464_v0, 16  ;;  %v725_v10 = vshll.u32 %v5809_v23, 16  ;;  %v6500_v29 = vsel %vm5829_vm15, %v704_v50, %v709_v48  ;;  %v1070_v8 = vcombine.low %v6469_v49, %v6475_v37 }
  0x5c   :  { %7981 = vst [vmem:[#allocation71_spill] sm:$0xff] %v6500_v29  ;;  %v6504_v31 = vsel %vm5829_vm15, %v712_v42, %v717_v32  ;;  %v1071_v58 = vcombine.low %v6483_v43, %v6489_v53  ;;  %5529 = vmatmul.mubr.msk.bf16.gmra.mrb[8].mxu1 %vm1278_vm1, %v1265_v36  ;;  %v1072_v45 = vcombine.low %v703_v9, %v6500_v29  ;;  %vm5268_vm7 = vcmask 1046534  }
  0x5d   :  { %v6513_v56 = vsel %vm5829_vm15, %v720_v5, %v725_v10  ;;  %v2167_v41 = vcombine.low %v5794_v17, %v5813_v24  ;;  %v2168_v32 = vcombine.low %v5817_v25, %v5797_v18  ;;  %5568 = vmatprep.mubr.msk.bf16.mxu1 %vm5729_vm0, %v7935_v52  ;;  %v1080_v36 = vrot.slane %v1070_v8, %v5784_v14 }
  0x5e   :  { %7982 = vst [vmem:[#allocation72_spill] sm:$0xff] %v6513_v56  ;;  %v1073_v42 = vcombine.low %v6504_v31, %v6513_v56  ;;  %v1087_v50 = vrot.slane %v1071_v58, %v5784_v14  ;;  %v2169_v48 = vcombine.low %v5800_v19, %v5821_v26  ;;  %v1094_v9 = vrot.slane %v1072_v45, %v5784_v14 }
  0x5f   :  { %v2170_v24 = vcombine.low %v5825_v27, %v5806_v21  ;;  %v2177_v25 = vrot.slane %v2167_v41, %v5784_v14  ;;  %v2184_v5 = vrot.slane %v2168_v32, %v5784_v14  ;;  %v1389_v8 = vcombine.low %v5791_v16, %v5794_v17 }
  0x60   :  { %v1101_v10 = vrot.slane %v1073_v42, %v5784_v14  ;;  %v1102_v53 = vcombine.low %v1080_v36, %v1087_v50  ;;  %v2191_v56 = vrot.slane %v2169_v48, %v5784_v14  ;;  %v5374_v45 = vcombine.high %v5791_v16, %v5794_v17 }
  0x61   :  { %v2198_v58 = vrot.slane %v2170_v24, %v5784_v14  ;;  %v2199_v29 = vcombine.low %v2177_v25, %v2184_v5  ;;  %v1391_v27 = vcombine.low %v5797_v18, %v5800_v19  ;;  %v1392_v42 = vcombine.low %v5821_v26, %v5803_v20 }
  0x62   :  { %v1103_v41 = vcombine.low %v1094_v9, %v1101_v10  ;;  %v1110_v32 = vrot.slane %v1102_v53, %v5784_v14  ;;  %v1399_v36 = vrot.slane %v1389_v8, %v5784_v14  ;;  %v6548_v24 = vrot.slane %v5374_v45, %v5784_v14  ;;  %v5697_v8 = vld [vmem:[%s7818_s1 + $0x30] sm:$0xff]  }
  0x63   :  { %v2200_v50 = vcombine.low %v2191_v56, %v2198_v58  ;;  %v2207_v48 = vrot.slane %v2199_v29, %v5784_v14  ;;  %v6551_v25 = vrot.slane %v1391_v27, %v5784_v14  ;;  %v1420_v17 = vrot.slane %v1392_v42, %v5784_v14 }
  0x64   :  { %v1117_v16 = vrot.slane %v1103_v41, %v5784_v14  ;;  %v5391_v53 = vcombine.high %v5803_v20, %v5806_v21  ;;  %v2217_v26 = vcombine.low %v6014_v47, %v6021_v57  ;;  %v1421_v29 = vcombine.low %v1399_v36, %v6548_v24 }
  0x65   :  { %v2214_v56 = vrot.slane %v2200_v50, %v5784_v14  ;;  %v5392_v9 = vcombine.high %v6014_v47, %v6021_v57  ;;  %v2219_v5 = vcombine.low %v6029_v62, %v6033_v63  ;;  %v1422_v20 = vcombine.low %v6551_v25, %v1420_v17 }
  0x66   :  { %v1118_v10 = vcombine.low %v1110_v32, %v1117_v16  ;;  %v2226_v58 = vrot.slane %v5391_v53, %v5784_v14  ;;  %v2233_v45 = vrot.slane %v2217_v26, %v5784_v14  ;;  %v1429_v41 = vrot.slane %v1421_v29, %v5784_v14 }
  0x67   :  { %v2215_v27 = vcombine.low %v2207_v48, %v2214_v56  ;;  %v2240_v42 = vrot.slane %v5392_v9, %v5784_v14  ;;  %v2247_v36 = vrot.slane %v2219_v5, %v5784_v14  ;;  %v1436_v63 = vrot.slane %v1422_v20, %v5784_v14 }
  0x68   :  { %5517 = vmatmul.mubr.msk.bf16.gmra.mrb[12].mxu0 %vm1278_vm1, %v1118_v10  ;;  %v2248_v32 = vcombine.low %v2226_v58, %v2233_v45  ;;  %v1438_v50 = vcombine.low %v5806_v21, %v6002_v34  ;;  %v1439_v16 = vcombine.low %v6010_v38, %v6014_v47  ;;  %v1440_v17 = vcombine.low %v6021_v57, %v6026_v59  ;;  %v5699_v47 = vld [vmem:[%s7818_s1 + $0x38] sm:$0xff]   ;;  %v5698_v58 = vld [vmem:[%s7818_s1 + $0x40] sm:$0xff]  }
  0x69   :  { %5569 = vmatmul.mubr.msk.bf16.vlgmr.msra.gmra.mrb[12].mxu1 %vm1278_vm1, %v2215_v27  ;;  %5536 = vmatprep.mubr.msk.bf16.mxu0 %vm5729_vm0, %v7935_v52  ;;  %v2249_v48 = vcombine.low %v2240_v42, %v2247_v36  ;;  %v1441_v53 = vcombine.low %v6017_v51, %v6029_v62  ;;  %v1437_v21 = vcombine.low %v1429_v41, %v1436_v63  ;;  %vm5271_vm8 = vcmask 1047559  }
  0x6a   :  { %5597 = vmatpush3.bf16.msra.mxu1 %v5697_v8  ;;  %5572 = vmatprep.mubr.msk.bf16.mxu1 %vm5729_vm0, %v7935_v52  ;;  %v2256_v26 = vrot.slane %v2248_v32, %v5784_v14  ;;  %v1448_v38 = vrot.slane %v1438_v50, %v5784_v14  ;;  %v6596_v57 = vrot.slane %v1439_v16, %v5784_v14 }
  0x6b   :  { %v2263_v56 = vrot.slane %v2249_v48, %v5784_v14  ;;  %v6599_v59 = vrot.slane %v1440_v17, %v5784_v14  ;;  %v1469_v29 = vrot.slane %v1441_v53, %v5784_v14  ;;  %5598 = vmatprep.subr.bf16.mxu1 %v7935_v52  ;;  %v2265_v9 = vcombine.low %v6226_v35, %v6235_v54 }
  0x6c   :  { %v2266_v5 = vcombine.low %v6241_v40, %v6245_v13  ;;  %v2267_v10 = vcombine.low %v6254_v2, %v6257_v33  ;;  %v5393_v8 = vcombine.high %v6248_v55, %v6257_v33  ;;  %v1470_v45 = vcombine.low %v1448_v38, %v6596_v57 }
  0x6d   :  { %v2264_v20 = vcombine.low %v2256_v26, %v2263_v56  ;;  %v1471_v27 = vcombine.low %v6599_v59, %v1469_v29  ;;  %v5375_v35 = vcombine.high %v6017_v51, %v6029_v62  ;;  %v2275_v41 = vrot.slane %v2265_v9, %v5784_v14 }
  0x6e   :  { %v2282_v42 = vrot.slane %v2266_v5, %v5784_v14  ;;  %v2289_v36 = vrot.slane %v2267_v10, %v5784_v14  ;;  %v2296_v63 = vrot.slane %v5393_v8, %v5784_v14  ;;  %5599 = vmatpush3.bf16.msra.mxu1 %v5699_v47  ;;  %v1478_v32 = vrot.slane %v1470_v45, %v5784_v14 }
  0x6f   :  { %v1485_v50 = vrot.slane %v1471_v27, %v5784_v14  ;;  %v1488_v16 = vcombine.low %v6235_v54, %v6241_v40  ;;  %v1489_v48 = vcombine.low %v6245_v13, %v6248_v55  ;;  %v1490_v17 = vcombine.low %v6257_v33, %v6263_v1  ;;  %v5700_v13 = vld [vmem:[%s7818_s1 + $0x48] sm:$0xff]  }
  0x70   :  { %5537 = vmatmul.mubr.msk.bf16.vlgmr.msra.gmra.mrb[0].mxu0 %vm1278_vm1, %v1437_v21  ;;  %v2297_v51 = vcombine.low %v2275_v41, %v2282_v42  ;;  %v2298_v62 = vcombine.low %v2289_v36, %v2296_v63  ;;  %v6632_v53 = vrot.slane %v5375_v35, %v5784_v14  ;;  %v2314_v29 = vcombine.low %v6423_v44, %v6437_v15 }
  0x71   :  { %5573 = vmatmul.mubr.msk.bf16.gmra.mrb[16].mxu1 %vm1278_vm1, %v2264_v20  ;;  %5629 = vmatpush3.bf16.msra.mxu0 %v5698_v58  ;;  %v1486_v26 = vcombine.low %v1478_v32, %v1485_v50  ;;  %v6636_v38 = vrot.slane %v1488_v16, %v5784_v14  ;;  %v1511_v47 = vrot.slane %v1489_v48, %v5784_v14 }
  0x72   :  { %5540 = vmatprep.mubr.msk.bf16.mxu0 %vm5729_vm0, %v7935_v52  ;;  %5576 = vmatprep.mubr.msk.bf16.mxu1 %vm5729_vm0, %v7935_v52  ;;  %v2305_v55 = vrot.slane %v2297_v51, %v5784_v14  ;;  %v2312_v33 = vrot.slane %v2298_v62, %v5784_v14  ;;  %v1518_v21 = vrot.slane %v1490_v17, %v5784_v14 }
  0x73   :  { %v1519_v56 = vcombine.low %v6632_v53, %v6636_v38  ;;  %v5394_v9 = vcombine.high %v6423_v44, %v6437_v15  ;;  %v2316_v5 = vcombine.low %v6447_v39, %v6460_v46  ;;  %5630 = vmatprep.subr.bf16.mxu0 %v7935_v52  ;;  %v2317_v20 = vcombine.low %v6464_v0, %v5809_v23 }
  0x74   :  { %v2313_v10 = vcombine.low %v2305_v55, %v2312_v33  ;;  %v1520_v8 = vcombine.low %v1511_v47, %v1518_v21  ;;  %v1536_v58 = vcombine.low %v6269_v6, %v6423_v44  ;;  %v2324_v27 = vrot.slane %v2314_v29, %v5784_v14 }
  0x75   :  { %v1527_v45 = vrot.slane %v1519_v56, %v5784_v14  ;;  %v2331_v35 = vrot.slane %v5394_v9, %v5784_v14  ;;  %v2338_v41 = vrot.slane %v2316_v5, %v5784_v14  ;;  %5631 = vmatpush3.bf16.msra.mxu0 %v5700_v13  ;;  %v2345_v42 = vrot.slane %v2317_v20, %v5784_v14  ;;  %v7983_v20 = vld [vmem:[#allocation10_spill] sm:$0xff] }
  0x76   :  { %v1534_v46 = vrot.slane %v1520_v8, %v5784_v14  ;;  %v1537_v36 = vcombine.low %v6437_v15, %v6441_v61  ;;  %v1538_v0 = vcombine.low %v6444_v60, %v6447_v39  ;;  %v5376_v44 = vcombine.high %v6444_v60, %v6447_v39 }
  0x77   :  { %v2346_v6 = vcombine.low %v2324_v27, %v2331_v35  ;;  %v6675_v63 = vrot.slane %v1536_v58, %v5784_v14  ;;  %v2363_v32 = vcombine.low %v5899_v3, %v5903_v4  ;;  %v2347_v16 = vcombine.low %v2338_v41, %v2345_v42  ;;  %v7984_v27 = vld [vmem:[#allocation11_spill] sm:$0xff] }
  0x78   :  { %5541 = vmatmul.mubr.msk.bf16.gmra.mrb[4].mxu0 %vm1278_vm1, %v1486_v26  ;;  %v1535_v50 = vcombine.low %v1527_v45, %v1534_v46  ;;  %v6681_v48 = vrot.slane %v1537_v36, %v5784_v14  ;;  %v1560_v15 = vrot.slane %v1538_v0, %v5784_v14  ;;  %v6689_v60 = vrot.slane %v5376_v44, %v5784_v14  ;;  %v7986_v44 = vld [vmem:[#allocation33_spill] sm:$0xff] }
  0x79   :  { %5577 = vmatmul.mubr.msk.bf16.gmra.mrb[20].mxu1 %vm1278_vm1, %v2313_v10  ;;  %5544 = vmatprep.mubr.msk.bf16.mxu0 %vm5729_vm0, %v7935_v52  ;;  %v2354_v61 = vrot.slane %v2346_v6, %v5784_v14  ;;  %v2364_v39 = vcombine.low %v5912_v11, %v5919_v22  ;;  %v2361_v51 = vrot.slane %v2347_v16, %v5784_v14  ;;  %v7985_v6 = vld [vmem:[#allocation34_spill] sm:$0xff]  ;;  %v7987_v16 = vld [vmem:[#allocation31_spill] sm:$0xff] }
  0x7a   :  { %5580 = vmatprep.mubr.msk.bf16.mxu1 %vm5729_vm0, %v7935_v52  ;;  %v1568_v62 = vcombine.low %v6675_v63, %v6681_v48  ;;  %v5395_v17 = vcombine.high %v5907_v7, %v5919_v22  ;;  %v2366_v26 = vcombine.low %v5915_v12, %v5926_v30  ;;  %v1569_v47 = vcombine.low %v1560_v15, %v6689_v60  ;;  %v7988_v15 = vld [vmem:[#allocation36_spill] sm:$0xff] }
  0x7b   :  { %v2373_v13 = vrot.slane %v2363_v32, %v5784_v14  ;;  %v2380_v55 = vrot.slane %v2364_v39, %v5784_v14  ;;  %v1585_v33 = vcombine.low %v5809_v23, %v5899_v3  ;;  %v2362_v21 = vcombine.low %v2354_v61, %v2361_v51  ;;  %v7989_v39 = vld [vmem:[#allocation38_spill] sm:$0xff] }
  0x7c   :  { %v1576_v56 = vrot.slane %v1568_v62, %v5784_v14  ;;  %v2387_v29 = vrot.slane %v5395_v17, %v5784_v14  ;;  %v2394_v9 = vrot.slane %v2366_v26, %v5784_v14  ;;  %v1583_v5 = vrot.slane %v1569_v47, %v5784_v14 }
  0x7d   :  { %v2395_v10 = vcombine.low %v2373_v13, %v2380_v55  ;;  %v1586_v8 = vcombine.low %v5903_v4, %v5907_v7  ;;  %v1587_v58 = vcombine.low %v5919_v22, %v7983_v20  ;;  %v1588_v35 = vcombine.low %v7984_v27, %v5915_v12 }
  0x7e   :  { %v2396_v45 = vcombine.low %v2387_v29, %v2394_v9  ;;  %v6718_v41 = vrot.slane %v1585_v33, %v5784_v14  ;;  %v5396_v46 = vcombine.high %v5915_v12, %v5926_v30  ;;  %v1584_v42 = vcombine.low %v1576_v56, %v1583_v5  ;;  %v7992_v29 = vld [vmem:[#allocation30_spill] sm:$0xff] }
  0x7f   :  { %v2403_v36 = vrot.slane %v2395_v10, %v5784_v14  ;;  %v1602_v0 = vrot.slane %v1586_v8, %v5784_v14  ;;  %v1609_v4 = vrot.slane %v1587_v58, %v5784_v14  ;;  %v6728_v22 = vrot.slane %v1588_v35, %v5784_v14 }
  0x80   :  { %5545 = vmatmul.mubr.msk.bf16.gmra.mrb[8].mxu0 %vm1278_vm1, %v1535_v50  ;;  %v2410_v7 = vrot.slane %v2396_v45, %v5784_v14  ;;  %v2413_v32 = vcombine.low %v7986_v44, %v7985_v6  ;;  %v2414_v12 = vcombine.low %v7988_v15, %v7987_v16  ;;  %v7990_v50 = vld [vmem:[#allocation37_spill] sm:$0xff]  ;;  %v2422_v62 = vrot.slane %v5396_v46, %v5784_v14  ;;  %v7993_v46 = vld [vmem:[#allocation55_spill] sm:$0xff] }
  0x81   :  { %5581 = vmatmul.mubr.msk.bf16.gmra.mrb[24].mxu1 %vm1278_vm1, %v2362_v21  ;;  %5548 = vmatprep.mubr.msk.bf16.mxu0 %vm5729_vm0, %v7935_v52  ;;  %v1617_v61 = vcombine.low %v6718_v41, %v1602_v0  ;;  %v2415_v51 = vcombine.low %v7990_v50, %v7989_v39  ;;  %v1618_v26 = vcombine.low %v1609_v4, %v6728_v22  ;;  %v7991_v21 = vld [vmem:[#allocation28_spill] sm:$0xff]  ;;  %v7995_v0 = vld [vmem:[#allocation6_spill] sm:$0xff]  ;;  %v7996_v4 = vld [vmem:[#allocation7_spill] sm:$0xff] }
  0x82   :  { %5584 = vmatprep.mubr.msk.bf16.mxu1 %vm5729_vm0, %v7935_v52  ;;  %v2411_v17 = vcombine.low %v2403_v36, %v2410_v7  ;;  %v2429_v47 = vrot.slane %v2413_v32, %v5784_v14  ;;  %v2436_v13 = vrot.slane %v2414_v12, %v5784_v14  ;;  %v1634_v56 = vcombine.low %v5926_v30, %v7991_v21  ;;  %v7994_v30 = vld [vmem:[#allocation52_spill] sm:$0xff]  ;;  %v8006_v21 = vld [vmem:[#allocation54_spill] sm:$0xff] }
  0x83   :  { %v1625_v55 = vrot.slane %v1617_v61, %v5784_v14  ;;  %v2443_v33 = vrot.slane %v2415_v51, %v5784_v14  ;;  %v1635_v9 = vcombine.low %v7992_v29, %v7986_v44  ;;  %v1632_v5 = vrot.slane %v1618_v26, %v5784_v14  ;;  %v7998_v32 = vld [vmem:[#allocation8_spill] sm:$0xff] }
  0x84   :  { %v2444_v10 = vcombine.low %v2422_v62, %v2429_v47  ;;  %v5377_v8 = vcombine.high %v7992_v29, %v7986_v44  ;;  %v1637_v58 = vcombine.low %v7987_v16, %v7990_v50  ;;  %v6758_v27 = vrot.slane %v1634_v56, %v5784_v14  ;;  %v7999_v44 = vld [vmem:[#allocation9_spill] sm:$0xff]  ;;  %v8003_v62 = vld [vmem:[#allocation32_spill] sm:$0xff]  ;;  %v8007_v29 = vld [vmem:[#allocation59_spill] sm:$0xff] }
  0x85   :  { %v2445_v45 = vcombine.low %v2436_v13, %v2443_v33  ;;  %v1651_v35 = vrot.slane %v1635_v9, %v5784_v14  ;;  %v2461_v36 = vcombine.low %v7994_v30, %v7993_v46  ;;  %v7997_v7 = vcombine.low %v7995_v0, %v7996_v4  ;;  %v8004_v26 = vld [vmem:[#allocation20_spill] sm:$0xff]  ;;  %v8008_v9 = vld [vmem:[#allocation57_spill] sm:$0xff] }
  0x86   :  { %v8000_v15 = vcombine.low %v7998_v32, %v7999_v44  ;;  %v6772_v61 = vrot.slane %v5377_v8, %v5784_v14  ;;  %v6775_v51 = vrot.slane %v1637_v58, %v5784_v14  ;;  %v8005_v47 = vcombine.low %v8003_v62, %v8004_v26  ;;  %v8009_v44 = vld [vmem:[#allocation19_spill] sm:$0xff]  ;;  %v8012_v26 = vld [vmem:[#allocation60_spill] sm:$0xff] }
  0x87   :  { %v3202_v6 = vrot.slane %v7997_v7, %v5784_v14  ;;  %v2452_v33 = vrot.slane %v2444_v10, %v5784_v14  ;;  %v5397_v56 = vcombine.high %v8006_v21, %v7993_v46  ;;  %v2463_v0 = vcombine.low %v8008_v9, %v8007_v29 }
  0x88   :  { %v3209_v12 = vrot.slane %v8000_v15, %v5784_v14  ;;  %8001 = vst [vmem:[#allocation10_spill] sm:$0xff] %v6772_v61  ;;  %8002 = vst [vmem:[#allocation11_spill] sm:$0xff] %v6775_v51  ;;  %v3216_v13 = vrot.slane %v8005_v47, %v5784_v14  ;;  %5549 = vmatmul.mubr.msk.bf16.gmra.mrb[12].mxu0 %vm1278_vm1, %v1584_v42  ;;  %v2459_v8 = vrot.slane %v2445_v45, %v5784_v14  ;;  %v8010_v15 = vld [vmem:[#allocation56_spill] sm:$0xff] }
  0x89   :  { %v5398_v58 = vcombine.high %v8008_v9, %v8007_v29  ;;  %v2471_v4 = vrot.slane %v2461_v36, %v5784_v14  ;;  %v1683_v7 = vcombine.low %v7989_v39, %v8006_v21  ;;  %5585 = vmatmul.mubr.msk.bf16.gmra.mrb[28].mxu1 %vm1278_vm1, %v2411_v17  ;;  %5552 = vmatprep.mubr.msk.bf16.mxu0 %vm5729_vm0, %v7935_v52  ;;  %v3129_v45 = vshrl.u32 %v8009_v44, 16 }
  0x8a   :  { %v1633_v10 = vcombine.low %v1625_v55, %v1632_v5  ;;  %v1666_v32 = vcombine.low %v6758_v27, %v1651_v35  ;;  %v2478_v42 = vrot.slane %v5397_v56, %v5784_v14  ;;  %5588 = vmatprep.mubr.msk.bf16.mxu1 %vm5729_vm0, %v7935_v52  ;;  %v1667_v36 = vcombine.low %v6772_v61, %v6775_v51  ;;  %v8011_v5 = vld [vmem:[#allocation58_spill] sm:$0xff]  ;;  %v5413_v56 = vld.sshfl [vmem:[%s7817_s0 + $0x14] sm:$0x1 pattern:$0x75316420]  ;;  %v8013_v61 = vld [vmem:[#allocation35_spill] sm:$0xff] }
  0x8b   :  { %v2485_v39 = vrot.slane %v2463_v0, %v5784_v14  ;;  %v2492_v17 = vrot.slane %v5398_v58, %v5784_v14  ;;  %v1684_v62 = vcombine.low %v7993_v46, %v8010_v15  ;;  %v1685_v35 = vcombine.low %v8011_v5, %v8008_v9 }
  0x8c   :  { %v2493_v55 = vcombine.low %v2471_v4, %v2478_v42  ;;  %v1686_v47 = vcombine.low %v8007_v29, %v8012_v26  ;;  %v1693_v21 = vrot.slane %v1683_v7, %v5784_v14  ;;  %v2460_v51 = vcombine.low %v2452_v33, %v2459_v8  ;;  %v8017_v26 = vld [vmem:[#allocation23_spill] sm:$0xff] }
  0x8d   :  { %v2494_v0 = vcombine.low %v2485_v39, %v2492_v17  ;;  %v1700_v58 = vrot.slane %v1684_v62, %v5784_v14  ;;  %v3217_v16 = vcombine.low %v8013_v61, %v3202_v6  ;;  %v6819_v4 = vrot.slane %v1685_v35, %v5784_v14  ;;  %v8014_v62 = vld [vmem:[#allocation22_spill] sm:$0xff]  ;;  %v8016_v35 = vld [vmem:[#allocation24_spill] sm:$0xff] }
  0x8e   :  { %v2501_v46 = vrot.slane %v2493_v55, %v5784_v14  ;;  %v6822_v9 = vrot.slane %v1686_v47, %v5784_v14  ;;  %v3218_v29 = vcombine.low %v3209_v12, %v3216_v13  ;;  %v6829_v33 = vrot.slane %v5413_v56, %v5784_v14  ;;  %v8018_v56 = vld [vmem:[#allocation46_spill] sm:$0xff] }
  0x8f   :  { %v2508_v7 = vrot.slane %v2494_v0, %v5784_v14  ;;  %v1715_v42 = vcombine.low %v1693_v21, %v1700_v58  ;;  %v6826_v5 = vrot.slane %v3217_v16, %v5784_v14  ;;  %v1674_v6 = vrot.slane %v1666_v32, %v5784_v14  ;;  %v8019_v0 = vld [vmem:[#allocation27_spill] sm:$0xff] }
  0x90   :  { %v1716_v61 = vcombine.low %v6819_v4, %v6822_v9  ;;  %v6835_v8 = vrot.slane %v3218_v29, %v5784_v14  ;;  %5553 = vmatmul.mubr.msk.bf16.gmra.mrb[16].mxu0 %vm1278_vm1, %v1633_v10  ;;  %v1681_v12 = vrot.slane %v1667_v36, %v5784_v14  ;;  %v3134_v16 = vshll.u32 %v6829_v33, 16  ;;  %v5414_v10 = vld.sshfl [vmem:[%s7817_s0 + $0x20] sm:$0x1 pattern:$0x75316420] }
  0x91   :  { %v2509_v13 = vcombine.low %v2501_v46, %v2508_v7  ;;  %v1723_v39 = vrot.slane %v1715_v42, %v5784_v14  ;;  %5589 = vmatmul.mubr.msk.bf16.gmra.mrb[32].mxu1 %vm1278_vm1, %v2460_v51  ;;  %5556 = vmatprep.mubr.msk.bf16.mxu0 %vm5729_vm0, %v7935_v52  ;;  %v8015_v51 = vld [vmem:[#allocation21_spill] sm:$0xff]  ;;  %v3235_v47 = vcombine.low %v8017_v26, %v8016_v35  ;;  %v3137_v29 = vshrl.u32 %v6254_v2, 16 }
  0x92   :  { %v1730_v32 = vrot.slane %v1716_v61, %v5784_v14  ;;  %v3233_v17 = vcombine.low %v6826_v5, %v6835_v8  ;;  %5592 = vmatprep.mubr.msk.bf16.mxu1 %vm5729_vm0, %v7935_v52  ;;  %v3136_v36 = vsel %vm5829_vm15, %v3129_v45, %v3134_v16  ;;  %v3234_v55 = vcombine.low %v8015_v51, %v8014_v62  ;;  %v8020_v42 = vld [vmem:[#allocation25_spill] sm:$0xff]  ;;  %v8021_v45 = vld [vmem:[#allocation26_spill] sm:$0xff] }
  0x93   :  { %v3237_v58 = vcombine.low %v8019_v0, %v8018_v56  ;;  %v5441_v46 = vcombine.high %v5797_v18, %v5800_v19  ;;  %v1682_v7 = vcombine.low %v1674_v6, %v1681_v12  ;;  %v3236_v5 = vcombine.low %v8020_v42, %v3136_v36  ;;  %v8022_v19 = vld [vmem:[#allocation53_spill] sm:$0xff]  ;;  %v8025_v0 = vld [vmem:[#allocation48_spill] sm:$0xff] }
  0x94   :  { %v1731_v21 = vcombine.low %v1723_v39, %v1730_v32  ;;  %v4020_v61 = vcombine.low %v8021_v45, %v6002_v34  ;;  %v6867_v8 = vrot.slane %v5414_v10, %v5784_v14  ;;  %v5415_v39 = vld.sshfl [vmem:[%s7817_s0 + $0x2c] sm:$0x1 pattern:$0x75316420]  ;;  %v3244_v16 = vrot.slane %v3234_v55, %v5784_v14  ;;  %v8023_v12 = vld [vmem:[#allocation69_spill] sm:$0xff] }
  0x95   :  { %v3251_v32 = vrot.slane %v3235_v47, %v5784_v14  ;;  %v3286_v2 = vcombine.low %v8022_v19, %v6469_v49  ;;  %v3265_v6 = vrot.slane %v3237_v58, %v5784_v14  ;;  %v4027_v34 = vrot.slane %v5441_v46, %v5784_v14  ;;  %v8024_v49 = vld [vmem:[#allocation51_spill] sm:$0xff]  ;;  %v8030_v19 = vld [vmem:[#allocation70_spill] sm:$0xff] }
  0x96   :  { %v3142_v18 = vshll.u32 %v6867_v8, 16  ;;  %v3145_v10 = vshrl.u32 %v8023_v12, 16  ;;  %v3258_v36 = vrot.slane %v3236_v5, %v5784_v14  ;;  %v4034_v62 = vrot.slane %v4020_v61, %v5784_v14  ;;  %v8026_v58 = vld [vmem:[#allocation47_spill] sm:$0xff] }
  0x97   :  { %v6886_v55 = vrot.slane %v5415_v39, %v5784_v14  ;;  %v3314_v26 = vrot.slane %v3286_v2, %v5784_v14  ;;  %v3266_v47 = vcombine.low %v3244_v16, %v3251_v32  ;;  %v4035_v56 = vcombine.low %v6548_v24, %v6551_v25  ;;  %v8029_v25 = vld [vmem:[#allocation71_spill] sm:$0xff] }
  0x98   :  { %5557 = vmatmul.mubr.msk.bf16.gmra.mrb[20].mxu0 %vm1278_vm1, %v1682_v7  ;;  %v3144_v51 = vsel %vm5829_vm15, %v3137_v29, %v3142_v18  ;;  %v3283_v46 = vcombine.low %v8026_v58, %v8025_v0  ;;  %v8028_v7 = vld [vmem:[#allocation49_spill] sm:$0xff]  ;;  %v4052_v45 = vcombine.low %v8009_v44, %v6829_v33  ;;  %v3332_v61 = vcombine.low %v6475_v37, %v6483_v43 }
  0x99   :  { %5593 = vmatmul.mubr.msk.bf16.gmra.mrb[36].mxu1 %vm1278_vm1, %v2509_v13  ;;  %5560 = vmatprep.mubr.msk.bf16.mxu0 %vm5729_vm0, %v7935_v52  ;;  %v3285_v35 = vcombine.low %v3144_v51, %v8024_v49  ;;  %v3150_v29 = vshll.u32 %v6886_v55, 16  ;;  %v8027_v13 = vld [vmem:[#allocation50_spill] sm:$0xff]  ;;  %v3267_v39 = vcombine.low %v3258_v36, %v3265_v6  ;;  %v4036_v16 = vcombine.low %v4027_v34, %v4034_v62  ;;  %v8031_v51 = vld [vmem:[#allocation12_spill] sm:$0xff] }
  0x9a   :  { %5600 = vmatprep.mubr.msk.bf16.mxu1 %vm5729_vm0, %v7935_v52  ;;  %v3284_v42 = vcombine.low %v8028_v7, %v8027_v13  ;;  %v3334_v32 = vcombine.low %v8029_v25, %v6504_v31  ;;  %v8032_v49 = vld [vmem:[#allocation72_spill] sm:$0xff]  ;;  %v3342_v0 = vrot.slane %v3332_v61, %v5784_v14  ;;  %v4043_v37 = vrot.slane %v4035_v56, %v5784_v14  ;;  %v5416_v31 = vld.sshfl [vmem:[%s7817_s0 + $0x38] sm:$0x1 pattern:$0x75316420] }
  0x9b   :  { %v3307_v5 = vrot.slane %v3285_v35, %v5784_v14  ;;  %v3152_v24 = vsel %vm5829_vm15, %v3145_v10, %v3150_v29  ;;  %v3335_v35 = vcombine.low %v8032_v49, %v8031_v51  ;;  %v4059_v43 = vrot.slane %v4052_v45, %v5784_v14  ;;  %v8033_v51 = vld [vmem:[#allocation29_spill] sm:$0xff] }
  0x9c   :  { %v3333_v2 = vcombine.low %v8030_v19, %v3152_v24  ;;  %v3356_v44 = vrot.slane %v3334_v32, %v5784_v14  ;;  %v3274_v34 = vrot.slane %v3266_v47, %v5784_v14  ;;  %v4050_v10 = vrot.slane %v4036_v16, %v5784_v14 }
  0x9d   :  { %v3316_v18 = vcombine.low %v3307_v5, %v3314_v26  ;;  %v3363_v6 = vrot.slane %v3335_v35, %v5784_v14  ;;  %v3293_v36 = vrot.slane %v3283_v46, %v5784_v14  ;;  %v3300_v62 = vrot.slane %v3284_v42, %v5784_v14  ;;  %v8034_v35 = vld [vmem:[#allocation14_spill] sm:$0xff] }
  0x9e   :  { %v3349_v33 = vrot.slane %v3333_v2, %v5784_v14  ;;  %v3281_v26 = vrot.slane %v3267_v39, %v5784_v14  ;;  %v4078_v47 = vcombine.low %v6867_v8, %v6263_v1  ;;  %v6939_v46 = vrot.slane %v5416_v31, %v5784_v14  ;;  %v5417_v1 = vld.sshfl [vmem:[%s7817_s0 + $0x44] sm:$0x1 pattern:$0x75316420] }
  0x9f   :  { %v3365_v58 = vcombine.low %v3356_v44, %v3363_v6  ;;  %v4061_v29 = vcombine.low %v4059_v43, %v6632_v53  ;;  %v4051_v42 = vcombine.low %v4043_v37, %v4050_v10  ;;  %v3153_v53 = vshrl.u32 %v5912_v11, 16  ;;  %v8037_v37 = vld [vmem:[#allocation16_spill] sm:$0xff]  ;;  %v8039_v6 = vld [vmem:[#allocation18_spill] sm:$0xff] }
  0xa0   :  { %5561 = vmatmul.mubr.msk.bf16.gmra.mrb[24].mxu0 %vm1278_vm1, %v1731_v21  ;;  %v3364_v56 = vcombine.low %v3342_v0, %v3349_v33  ;;  %v5442_v21 = vcombine.high %v6235_v54, %v6241_v40  ;;  %v3282_v5 = vcombine.low %v3274_v34, %v3281_v26  ;;  %v3315_v54 = vcombine.low %v3293_v36, %v3300_v62  ;;  %v8035_v0 = vld [vmem:[#allocation13_spill] sm:$0xff]  ;;  %v8038_v33 = vld [vmem:[#allocation39_spill] sm:$0xff] }
  0xa1   :  { %5601 = vmatmul.mubr.msk.bf16.vlgmr.msra.gmra.mrb[40].mxu1 %vm1278_vm1, %v3233_v17  ;;  %5632 = vmatprep.mubr.msk.bf16.mxu0 %vm5729_vm0, %v7935_v52  ;;  %v4060_v17 = vcombine.low %v6596_v57, %v6599_v59  ;;  %v6948_v7 = vrot.slane %v3365_v58, %v5784_v14  ;;  %v4092_v59 = vrot.slane %v4078_v47, %v5784_v14  ;;  %v3158_v8 = vshll.u32 %v6939_v46, 16  ;;  %v8040_v34 = vld [vmem:[#allocation15_spill] sm:$0xff]  ;;  %v5419_v26 = vld.sshfl [vmem:[%s7817_s0 + $0x5c] sm:$0x1 pattern:$0x75316420] }
  0xa2   :  { %5604 = vmatprep.mubr.msk.bf16.mxu1 %vm5729_vm0, %v7935_v52  ;;  %v6945_v13 = vrot.slane %v3364_v56, %v5784_v14  ;;  %v4085_v57 = vrot.slane %v5442_v21, %v5784_v14  ;;  %v4075_v61 = vrot.slane %v4061_v29, %v5784_v14  ;;  %v6963_v39 = vrot.slane %v5417_v1, %v5784_v14 }
  0xa3   :  { %v4068_v45 = vrot.slane %v4060_v17, %v5784_v14  ;;  %v3323_v16 = vrot.slane %v3315_v54, %v5784_v14  ;;  %v3330_v11 = vrot.slane %v3316_v18, %v5784_v14  ;;  %v4094_v25 = vcombine.low %v4092_v59, %v6675_v63  ;;  %v8036_v18 = vld [vmem:[#allocation17_spill] sm:$0xff] }
  0xa4   :  { %v3380_v40 = vcombine.low %v6945_v13, %v6948_v7  ;;  %v4093_v24 = vcombine.low %v6636_v38, %v4085_v57  ;;  %v3160_v32 = vsel %vm5829_vm15, %v3153_v53, %v3158_v8  ;;  %v4110_v2 = vcombine.low %v8023_v12, %v6886_v55  ;;  %v5418_v55 = vld.sshfl [vmem:[%s7817_s0 + $0x50] sm:$0x1 pattern:$0x75316420]  ;;  %v8043_v8 = vld [vmem:[#allocation61_spill] sm:$0xff] }
  0xa5   :  { %v4076_v19 = vcombine.low %v4068_v45, %v4075_v61  ;;  %v3161_v49 = vshrl.u32 %v8033_v51, 16  ;;  %v3381_v44 = vcombine.low %v8035_v0, %v8034_v35  ;;  %v3383_v43 = vcombine.low %v8037_v37, %v8036_v18 }
  0xa6   :  { %v3384_v38 = vcombine.low %v8039_v6, %v8038_v33  ;;  %v3166_v63 = vshll.u32 %v6963_v39, 16  ;;  %v3331_v31 = vcombine.low %v3323_v16, %v3330_v11  ;;  %v3382_v10 = vcombine.low %v3160_v32, %v8040_v34  ;;  %v8044_v16 = vld [vmem:[#allocation40_spill] sm:$0xff]  ;;  %v8048_v32 = vld [vmem:[#allocation45_spill] sm:$0xff] }
  0xa7   :  { %v4101_v36 = vrot.slane %v4093_v24, %v5784_v14  ;;  %v4108_v12 = vrot.slane %v4094_v25, %v5784_v14  ;;  %v4117_v62 = vrot.slane %v4110_v2, %v5784_v14  ;;  %v3391_v56 = vrot.slane %v3381_v44, %v5784_v14  ;;  %v8047_v25 = vld [vmem:[#allocation62_spill] sm:$0xff] }
  0xa8   :  { %5633 = vmatmul.mubr.msk.bf16.vlgmr.msra.gmra.mrb[28].mxu0 %vm1278_vm1, %v4051_v42  ;;  %v3405_v58 = vrot.slane %v3383_v43, %v5784_v14  ;;  %v3412_v21 = vrot.slane %v3384_v38, %v5784_v14  ;;  %v3168_v47 = vsel %vm5829_vm15, %v3161_v49, %v3166_v63  ;;  %v3398_v17 = vrot.slane %v3382_v10, %v5784_v14  ;;  %v8041_v42 = vld [vmem:[#allocation42_spill] sm:$0xff] }
  0xa9   :  { %5605 = vmatmul.mubr.msk.bf16.gmra.mrb[44].mxu1 %vm1278_vm1, %v3282_v5  ;;  %5636 = vmatprep.mubr.msk.bf16.mxu0 %vm5729_vm0, %v7935_v52  ;;  %v4119_v29 = vcombine.low %v6689_v60, %v6718_v41  ;;  %v8042_v5 = vld [vmem:[#allocation41_spill] sm:$0xff]  ;;  %v3169_v1 = vshrl.u32 %v7994_v30, 16  ;;  %v4109_v57 = vcombine.low %v4101_v36, %v4108_v12  ;;  %v3106_v59 = vrot.slane %v5418_v55, %v5784_v14  ;;  %v8045_v60 = vld [vmem:[#allocation44_spill] sm:$0xff]  ;;  %v8046_v41 = vld [vmem:[#allocation43_spill] sm:$0xff] }
  0xaa   :  { %5608 = vmatprep.mubr.msk.bf16.mxu1 %vm5729_vm0, %v7935_v52  ;;  %v3431_v54 = vcombine.low %v8042_v5, %v8041_v42  ;;  %v3120_v53 = vrot.slane %v5419_v26, %v5784_v14  ;;  %v3177_v45 = vshrl.u32 %v8043_v8, 16  ;;  %v4118_v61 = vcombine.low %v6681_v48, %v4117_v62  ;;  %v8049_v62 = vld [vmem:[#allocation65_spill] sm:$0xff]  ;;  %v8050_v26 = vld [vmem:[#allocation64_spill] sm:$0xff]  ;;  %v8053_v42 = vld [vmem:[#allocation67_spill] sm:$0xff] }
  0xab   :  { %v3430_v11 = vcombine.low %v8044_v16, %v3168_v47  ;;  %v3432_v24 = vcombine.low %v8046_v41, %v8045_v60  ;;  %v3433_v30 = vcombine.low %v8048_v32, %v8047_v25  ;;  %v4136_v2 = vcombine.low %v6939_v46, %v7983_v20  ;;  %v8054_v5 = vld [vmem:[#allocation66_spill] sm:$0xff]  ;;  %v8057_v25 = vld [vmem:[#allocation11_spill] sm:$0xff] }
  0xac   :  { %v4201_v49 = vcombine.low %v3106_v59, %v8010_v15  ;;  %v4202_v35 = vcombine.low %v8043_v8, %v3120_v53  ;;  %v3413_v0 = vcombine.low %v3391_v56, %v3398_v17  ;;  %v3414_v48 = vcombine.low %v3405_v58, %v3412_v21  ;;  %v8051_v58 = vld [vmem:[#allocation31_spill] sm:$0xff]  ;;  %v8056_v41 = vld [vmem:[#allocation10_spill] sm:$0xff] }
  0xad   :  { %v4133_v44 = vrot.slane %v4119_v29, %v5784_v14  ;;  %v3447_v18 = vrot.slane %v3431_v54, %v5784_v14  ;;  %v3174_v37 = vshll.u32 %v3106_v59, 16  ;;  %v3182_v43 = vshll.u32 %v3120_v53, 16  ;;  %v8052_v17 = vld [vmem:[#allocation63_spill] sm:$0xff] }
  0xae   :  { %v4209_v33 = vrot.slane %v4201_v49, %v5784_v14  ;;  %v4216_v6 = vrot.slane %v4202_v35, %v5784_v14  ;;  %v3454_v20 = vrot.slane %v3432_v24, %v5784_v14  ;;  %v3461_v15 = vrot.slane %v3433_v30, %v5784_v14 }
  0xaf   :  { %v4150_v38 = vrot.slane %v4136_v2, %v5784_v14  ;;  %v3421_v34 = vrot.slane %v3413_v0, %v5784_v14  ;;  %v3428_v10 = vrot.slane %v3414_v48, %v5784_v14  ;;  %v4152_v36 = vcombine.low %v6728_v22, %v6758_v27 }
  0xb0   :  { %5637 = vmatmul.mubr.msk.bf16.gmra.mrb[32].mxu0 %vm1278_vm1, %v4076_v19  ;;  %v5443_v19 = vcombine.high %v5809_v23, %v5899_v3  ;;  %v4126_v23 = vrot.slane %v4118_v61, %v5784_v14  ;;  %v3440_v3 = vrot.slane %v3430_v11, %v5784_v14  ;;  %v4217_v63 = vcombine.low %v4209_v33, %v6819_v4 }
  0xb1   :  { %5609 = vmatmul.mubr.msk.bf16.gmra.mrb[48].mxu1 %vm1278_vm1, %v3331_v31  ;;  %5640 = vmatprep.mubr.msk.bf16.mxu0 %vm5729_vm0, %v7935_v52  ;;  %v4218_v31 = vcombine.low %v6822_v9, %v4216_v6  ;;  %v3176_v4 = vsel %vm5829_vm15, %v3169_v1, %v3174_v37  ;;  %v3184_v9 = vsel %vm5829_vm15, %v3177_v45, %v3182_v43  ;;  %v8055_v1 = vld [vmem:[#allocation68_spill] sm:$0xff] }
  0xb2   :  { %5612 = vmatprep.mubr.msk.bf16.mxu1 %vm5729_vm0, %v7935_v52  ;;  %v4143_v46 = vrot.slane %v5443_v19, %v5784_v14  ;;  %v4225_v13 = vrot.slane %v4217_v63, %v5784_v14  ;;  %v3462_v12 = vcombine.low %v3440_v3, %v3447_v18  ;;  %v3463_v55 = vcombine.low %v3454_v20, %v3461_v15 }
  0xb3   :  { %v4232_v7 = vrot.slane %v4218_v31, %v5784_v14  ;;  %v3480_v56 = vcombine.low %v8050_v26, %v8049_v62  ;;  %v4168_v27 = vcombine.low %v8033_v51, %v6963_v39  ;;  %v5444_v21 = vcombine.high %v8051_v58, %v7990_v50 }
  0xb4   :  { %v4151_v22 = vcombine.low %v4143_v46, %v4150_v38  ;;  %v3429_v28 = vcombine.low %v3421_v34, %v3428_v10  ;;  %v3479_v29 = vcombine.low %v3176_v4, %v8052_v17  ;;  %v3481_v54 = vcombine.low %v8054_v5, %v8053_v42 }
  0xb5   :  { %v4233_v47 = vcombine.low %v4225_v13, %v4232_v7  ;;  %v3477_v59 = vrot.slane %v3463_v55, %v5784_v14  ;;  %v4166_v53 = vrot.slane %v4152_v36, %v5784_v14  ;;  %v3496_v8 = vrot.slane %v3480_v56, %v5784_v14  ;;  %v8058_v36 = vld [vmem:[#allocation5_spill] sm:$0xff] }
  0xb6   :  { %v3470_v39 = vrot.slane %v3462_v12, %v5784_v14  ;;  %v4159_v50 = vrot.slane %v4151_v22, %v5784_v14  ;;  %v4176_v51 = vrot.slane %v4168_v27, %v5784_v14  ;;  %v4183_v45 = vrot.slane %v5444_v21, %v5784_v14 }
  0xb7   :  { %v3489_v61 = vrot.slane %v3479_v29, %v5784_v14  ;;  %v3503_v16 = vrot.slane %v3481_v54, %v5784_v14  ;;  %v5730_v63 = vmov 1983009808  }
  0xb8   :  { %5641 = vmatmul.mubr.msk.bf16.gmra.mrb[36].mxu0 %vm1278_vm1, %v4109_v57  ;;  %v3482_v57 = vcombine.low %v8055_v1, %v3184_v9  ;;  %v4167_v60 = vcombine.low %v4159_v50, %v4166_v53  ;;  %v4184_v24 = vcombine.low %v4176_v51, %v8056_v41  ;;  %v4185_v32 = vcombine.low %v8057_v25, %v4183_v45 }
  0xb9   :  { %5613 = vmatmul.mubr.msk.bf16.gmra.mrb[52].mxu1 %vm1278_vm1, %v3380_v40  ;;  %5644 = vmatprep.mubr.msk.bf16.mxu0 %vm5729_vm0, %v7935_v52  ;;  %v4134_v40 = vcombine.low %v4126_v23, %v4133_v44  ;;  %v3478_v30 = vcombine.low %v3470_v39, %v3477_v59  ;;  %v3511_v19 = vcombine.low %v3489_v61, %v3496_v8  ;;  %v1870_v31 = vunpack.c.l.s4 %v5730_v63 }
  0xba   :  { %5616 = vmatprep.mubr.msk.bf16.mxu1 %vm5729_vm0, %v7935_v52  ;;  %v3510_v11 = vrot.slane %v3482_v57, %v5784_v14  ;;  %v4192_v49 = vrot.slane %v4184_v24, %v5784_v14  ;;  %v4199_v35 = vrot.slane %v4185_v32, %v5784_v14 }
  0xbb   :  { %v3519_v0 = vrot.slane %v3511_v19, %v5784_v14  ;;  %v1871_v34 = vunpack.c.0.s8 %v1870_v31 }
  0xbc   :  { %v3512_v2 = vcombine.low %v3503_v16, %v3510_v11  ;;  %v4200_v44 = vcombine.low %v4192_v49, %v4199_v35 }
  0xbd   :  { %v7115_v4 = vsub.s32 %v1871_v34, %v8058_v36 }
  0xbe   :  { %v3526_v48 = vrot.slane %v3512_v2, %v5784_v14 }
  0xc0   :  { %5645 = vmatmul.mubr.msk.bf16.gmra.mrb[40].mxu0 %vm1278_vm1, %v4134_v40  ;;  %v3527_v18 = vcombine.low %v3519_v0, %v3526_v48 }
  0xc1   :  { %5617 = vmatmul.mubr.msk.bf16.gmra.mrb[56].mxu1 %vm1278_vm1, %v3429_v28  ;;  %5648 = vmatprep.mubr.msk.bf16.mxu0 %vm5729_vm0, %v7935_v52 }
  0xc2   :  { %5620 = vmatprep.mubr.msk.bf16.mxu1 %vm5729_vm0, %v7935_v52 }
  0xc8   :  { %5649 = vmatmul.mubr.msk.bf16.gmra.mrb[44].mxu0 %vm1278_vm1, %v4167_v60 }
  0xc9   :  { %5621 = vmatmul.mubr.msk.bf16.gmra.mrb[60].mxu1 %vm1278_vm1, %v3478_v30  ;;  %5652 = vmatprep.mubr.msk.bf16.mxu0 %vm5729_vm0, %v7935_v52 }
  0xca   :  { %5624 = vmatprep.mubr.msk.bf16.mxu1 %vm5729_vm0, %v7935_v52 }
  0xd0   :  { %5653 = vmatmul.mubr.msk.bf16.gmra.mrb[48].mxu0 %vm1278_vm1, %v4200_v44 }
  0xd1   :  { %5625 = vmatmul.mubr.msk.bf16.gmra.mrb[64].mxu1 %vm1278_vm1, %v3527_v18  ;;  %5656 = vmatprep.mubr.msk.bf16.mxu0 %vm5729_vm0, %v7935_v52  ;;  %vm5156_vm0 = vcmask 1045504  }
  0xd8   :  { %5657 = vmatmul.mubr.msk.bf16.gmra.mrb[52].mxu0 %vm1278_vm1, %v4233_v47 }
  0xfb   :  { %v7102_v37 = vpop.f32.mrb[0].mxu1 }
  0xfc   :  { %v5522_v43 = vpop.f32.mrb[1].mxu1 }
  0xfd   :  { %v7104_v33 = vpop.f32.mrb[2].mxu1 }
  0xfe   :  { %v5523_v14 = vpop.f32.mrb[3].mxu1 }
 0x116   :  { %v7106_v6 = vpop.f32.mrb[4].mxu1 }
 0x117   :  { %v5526_v23 = vpop.f32.mrb[5].mxu1 }
 0x118   :  { %v7108_v3 = vpop.f32.mrb[6].mxu1 }
 0x119   :  { %v5527_v20 = vpop.f32.mrb[7].mxu1 }
 0x12f   :  { %v7110_v15 = vpop.f32.mrb[8].mxu1 }
 0x130   :  { %v5530_v46 = vpop.f32.mrb[9].mxu1 }
 0x131   :  { %v7112_v38 = vpop.f32.mrb[10].mxu1 }
 0x132   :  { %v5531_v52 = vpop.f32.mrb[11].mxu1 }
 0x13c   :  { %v2577_v10 = vpop.f32.mrb[12].mxu1 }
 0x13d   :  { %v5570_v9 = vpop.f32.mrb[13].mxu1  ;;  %v2646_v7 = vcombine.high %v2577_v10, %v2577_v10  ;;  %v2653_v12 = vrot.slane %v2577_v10, %v7115_v4 }
 0x13e   :  { %v2580_v13 = vpop.f32.mrb[14].mxu1 }
 0x13f   :  { %v5571_v40 = vpop.f32.mrb[15].mxu1  ;;  %v2663_v55 = vcombine.high %v2580_v13, %v2580_v13  ;;  %v2660_v62 = vrot.slane %v2646_v7, %v7115_v4  ;;  %v2670_v26 = vrot.slane %v2580_v13, %v7115_v4  ;;  %v2661_v47 = vcombine.high %v2653_v12, %v2653_v12 }
 0x141   :  { %v2677_v28 = vrot.slane %v2663_v55, %v7115_v4  ;;  %v2662_v53 = vcombine.high %v2660_v62, %v2660_v62  ;;  %v2678_v8 = vcombine.high %v2670_v26, %v2670_v26 }
 0x143   :  { %v1799_v56 = vpop.f32.mrb[0].mxu0  ;;  %v2679_v32 = vcombine.high %v2677_v28, %v2677_v28 }
 0x144   :  { %v1868_v22 = vcombine.high %v1799_v56, %v1799_v56  ;;  %v1875_v27 = vrot.slane %v1799_v56, %v7115_v4  ;;  %v5538_v58 = vpop.f32.mrb[1].mxu0  ;;  %v2585_v21 = vpop.f32.mrb[16].mxu1 }
 0x145   :  { %v1802_v17 = vpop.f32.mrb[2].mxu0  ;;  %v5574_v29 = vpop.f32.mrb[17].mxu1  ;;  %v2680_v50 = vcombine.high %v2585_v21, %v2585_v21  ;;  %v2687_v24 = vrot.slane %v2585_v21, %v7115_v4 }
 0x146   :  { %v1882_v42 = vrot.slane %v1868_v22, %v7115_v4  ;;  %v1883_v5 = vcombine.high %v1875_v27, %v1875_v27  ;;  %v7123_v54 = vadd.f32 %v2653_v12, %v1875_v27  ;;  %v1885_v1 = vcombine.high %v1802_v17, %v1802_v17  ;;  %v5539_v57 = vpop.f32.mrb[3].mxu0  ;;  %v2588_v59 = vpop.f32.mrb[18].mxu1 }
 0x147   :  { %v1892_v39 = vrot.slane %v1802_v17, %v7115_v4  ;;  %v5575_v51 = vpop.f32.mrb[19].mxu1  ;;  %v2697_v25 = vcombine.high %v2588_v59, %v2588_v59  ;;  %v2694_v35 = vrot.slane %v2680_v50, %v7115_v4  ;;  %v2704_v0 = vrot.slane %v2588_v59, %v7115_v4 }
 0x148   :  { %v1884_v45 = vcombine.high %v1882_v42, %v1882_v42  ;;  %v7126_v61 = vadd.f32 %v2661_v47, %v1883_v5  ;;  %v7128_v16 = vadd.f32 %v2660_v62, %v1882_v42  ;;  %v1899_v11 = vrot.slane %v1885_v1, %v7115_v4  ;;  %v4720_v1 = vld [vmem:[%s7820_s3] sm:$0xff] }
 0x149   :  { %v1900_v60 = vcombine.high %v1892_v39, %v1892_v39  ;;  %v7131_v41 = vadd.f32 %v2670_v26, %v1892_v39  ;;  %v2695_v20 = vcombine.high %v2687_v24, %v2687_v24  ;;  %v2711_v46 = vrot.slane %v2697_v25, %v7115_v4 }
 0x14a   :  { %v7134_v30 = vadd.f32 %v2662_v53, %v1884_v45  ;;  %v1901_v19 = vcombine.high %v1899_v11, %v1899_v11  ;;  %v7136_v2 = vadd.f32 %v2677_v28, %v1899_v11  ;;  %v2696_v7 = vcombine.high %v2694_v35, %v2694_v35 }
 0x14b   :  { %v7138_v49 = vadd.f32 %v2678_v8, %v1900_v60  ;;  %v1807_v48 = vpop.f32.mrb[4].mxu0  ;;  %v2712_v40 = vcombine.high %v2704_v0, %v2704_v0  ;;  %v2713_v17 = vcombine.high %v2711_v46, %v2711_v46 }
 0x14c   :  { %v7142_v44 = vadd.f32 %v2679_v32, %v1901_v19  ;;  %v1902_v18 = vcombine.high %v1807_v48, %v1807_v48  ;;  %v1909_v43 = vrot.slane %v1807_v48, %v7115_v4  ;;  %v5542_v14 = vpop.f32.mrb[5].mxu0  ;;  %v2593_v23 = vpop.f32.mrb[20].mxu1  ;;  %v4724_v19 = vcombine.high %v4720_v1, %v4720_v1 }
 0x14d   :  { %v1810_v52 = vpop.f32.mrb[6].mxu0  ;;  %v5578_v63 = vpop.f32.mrb[21].mxu1  ;;  %v2714_v55 = vcombine.high %v2593_v23, %v2593_v23  ;;  %v2721_v47 = vrot.slane %v2593_v23, %v7115_v4 }
 0x14e   :  { %v1916_v31 = vrot.slane %v1902_v18, %v7115_v4  ;;  %v1917_v34 = vcombine.high %v1909_v43, %v1909_v43  ;;  %v7147_v10 = vadd.f32 %v2687_v24, %v1909_v43  ;;  %v1919_v36 = vcombine.high %v1810_v52, %v1810_v52  ;;  %v5543_v9 = vpop.f32.mrb[7].mxu0  ;;  %v2596_v13 = vpop.f32.mrb[22].mxu1 }
 0x14f   :  { %v1926_v12 = vrot.slane %v1810_v52, %v7115_v4  ;;  %v5579_v62 = vpop.f32.mrb[23].mxu1  ;;  %v2731_v28 = vcombine.high %v2596_v13, %v2596_v13  ;;  %v2728_v59 = vrot.slane %v2714_v55, %v7115_v4  ;;  %v2738_v53 = vrot.slane %v2596_v13, %v7115_v4 }
 0x150   :  { %v1918_v26 = vcombine.high %v1916_v31, %v1916_v31  ;;  %v7150_v56 = vadd.f32 %v2695_v20, %v1917_v34  ;;  %v7152_v22 = vadd.f32 %v2694_v35, %v1916_v31  ;;  %v1933_v27 = vrot.slane %v1919_v36, %v7115_v4 }
 0x151   :  { %v1934_v58 = vcombine.high %v1926_v12, %v1926_v12  ;;  %v7155_v21 = vadd.f32 %v2704_v0, %v1926_v12  ;;  %v2729_v60 = vcombine.high %v2721_v47, %v2721_v47  ;;  %v2745_v24 = vrot.slane %v2731_v28, %v7115_v4 }
 0x152   :  { %v7158_v29 = vadd.f32 %v2696_v7, %v1918_v26  ;;  %v1935_v42 = vcombine.high %v1933_v27, %v1933_v27  ;;  %v7160_v5 = vadd.f32 %v2711_v46, %v1933_v27  ;;  %v2730_v23 = vcombine.high %v2728_v59, %v2728_v59 }
 0x153   :  { %v7165_v57 = vadd.f32 %v2712_v40, %v1934_v58  ;;  %v1815_v8 = vpop.f32.mrb[8].mxu0  ;;  %v2746_v20 = vcombine.high %v2738_v53, %v2738_v53  ;;  %v2747_v55 = vcombine.high %v2745_v24, %v2745_v24  ;;  %v4721_v58 = vld [vmem:[%s7820_s3 + $0x8] sm:$0x3f] }
 0x154   :  { %v7169_v39 = vadd.f32 %v2713_v17, %v1935_v42  ;;  %v1936_v50 = vcombine.high %v1815_v8, %v1815_v8  ;;  %v1943_v51 = vrot.slane %v1815_v8, %v7115_v4  ;;  %v5546_v45 = vpop.f32.mrb[9].mxu0  ;;  %v2601_v11 = vpop.f32.mrb[24].mxu1  ;;  %v7196_v42 = vrot.slane %v4720_v1, %v7115_v4 }
 0x155   :  { %v1818_v25 = vpop.f32.mrb[10].mxu0  ;;  %v5582_v32 = vpop.f32.mrb[25].mxu1  ;;  %v2748_v52 = vcombine.high %v2601_v11, %v2601_v11  ;;  %v2755_v40 = vrot.slane %v2601_v11, %v7115_v4  ;;  %v7202_v45 = vrot.slane %v4724_v19, %v7115_v4 }
 0x156   :  { %v1950_v35 = vrot.slane %v1936_v50, %v7115_v4  ;;  %v1951_v0 = vcombine.high %v1943_v51, %v1943_v51  ;;  %v7174_v48 = vadd.f32 %v2721_v47, %v1943_v51  ;;  %v1953_v18 = vcombine.high %v1818_v25, %v1818_v25  ;;  %v5547_v43 = vpop.f32.mrb[11].mxu0  ;;  %v2604_v14 = vpop.f32.mrb[26].mxu1 }
 0x157   :  { %v1960_v46 = vrot.slane %v1818_v25, %v7115_v4  ;;  %v5583_v63 = vpop.f32.mrb[27].mxu1  ;;  %v2765_v12 = vcombine.high %v2604_v14, %v2604_v14  ;;  %v2762_v28 = vrot.slane %v2748_v52, %v7115_v4  ;;  %v2763_v11 = vcombine.high %v2755_v40, %v2755_v40 }
 0x158   :  { %v1952_v31 = vcombine.high %v1950_v35, %v1950_v35  ;;  %v7177_v34 = vadd.f32 %v2729_v60, %v1951_v0  ;;  %v7179_v36 = vadd.f32 %v2728_v59, %v1950_v35  ;;  %v1967_v9 = vrot.slane %v1953_v18, %v7115_v4 }
 0x159   :  { %v1968_v13 = vcombine.high %v1960_v46, %v1960_v46  ;;  %v7182_v7 = vadd.f32 %v2738_v53, %v1960_v46  ;;  %v2772_v60 = vrot.slane %v2604_v14, %v7115_v4  ;;  %v4741_v35 = vcombine.high %v4721_v58, %v4721_v58 }
 0x15a   :  { %v7185_v62 = vadd.f32 %v2730_v23, %v1952_v31  ;;  %v1969_v26 = vcombine.high %v1967_v9, %v1967_v9  ;;  %v7187_v27 = vadd.f32 %v2745_v24, %v1967_v9  ;;  %v2779_v24 = vrot.slane %v2765_v12, %v7115_v4 }
 0x15b   :  { %v7192_v47 = vadd.f32 %v2746_v20, %v1968_v13  ;;  %v1823_v17 = vpop.f32.mrb[12].mxu0  ;;  %v2764_v46 = vcombine.high %v2762_v28, %v2762_v28  ;;  %v7211_v14 = vrot.slane %v4721_v58, %v7115_v4 }
 0x15c   :  { %v7198_v59 = vadd.f32 %v2747_v55, %v1969_v26  ;;  %v1970_v53 = vcombine.high %v1823_v17, %v1823_v17  ;;  %v1977_v8 = vrot.slane %v1823_v17, %v7115_v4  ;;  %v5550_v50 = vpop.f32.mrb[13].mxu0  ;;  %v2609_v51 = vpop.f32.mrb[28].mxu1 }
 0x15d   :  { %v1826_v25 = vpop.f32.mrb[14].mxu0  ;;  %v5586_v32 = vpop.f32.mrb[29].mxu1  ;;  %v2782_v52 = vcombine.high %v2609_v51, %v2609_v51 }
 0x15e   :  { %8059 = vst [vmem:[#allocation34_spill] sm:$0xff] %v7198_v59  ;;  %v1984_v1 = vrot.slane %v1970_v53, %v7115_v4  ;;  %v1985_v0 = vcombine.high %v1977_v8, %v1977_v8  ;;  %v7207_v18 = vadd.f32 %v2755_v40, %v1977_v8  ;;  %v1987_v43 = vcombine.high %v1826_v25, %v1826_v25  ;;  %v5551_v23 = vpop.f32.mrb[15].mxu0  ;;  %v2612_v20 = vpop.f32.mrb[30].mxu1 }
 0x15f   :  { %v1994_v19 = vrot.slane %v1826_v25, %v7115_v4  ;;  %v5587_v63 = vpop.f32.mrb[31].mxu1  ;;  %v2780_v40 = vcombine.high %v2772_v60, %v2772_v60  ;;  %v2799_v17 = vcombine.high %v2612_v20, %v2612_v20  ;;  %v2781_v53 = vcombine.high %v2779_v24, %v2779_v24 }
 0x160   :  { %8060 = vst [vmem:[#allocation33_spill] sm:$0xff] %v7207_v18  ;;  %v1986_v31 = vcombine.high %v1984_v1, %v1984_v1  ;;  %v7213_v9 = vadd.f32 %v2763_v11, %v1985_v0  ;;  %v7215_v13 = vadd.f32 %v2762_v28, %v1984_v1  ;;  %v2001_v12 = vrot.slane %v1987_v43, %v7115_v4 }
 0x161   :  { %v2002_v55 = vcombine.high %v1994_v19, %v1994_v19  ;;  %v7218_v26 = vadd.f32 %v2772_v60, %v1994_v19  ;;  %v2789_v11 = vrot.slane %v2609_v51, %v7115_v4  ;;  %v2796_v28 = vrot.slane %v2782_v52, %v7115_v4 }
 0x162   :  { %8061 = vst [vmem:[#allocation36_spill] sm:$0xff] %v7213_v9  ;;  %8062 = vst [vmem:[#allocation38_spill] sm:$0xff] %v7215_v13  ;;  %v7220_v8 = vadd.f32 %v2764_v46, %v1986_v31  ;;  %v2003_v50 = vcombine.high %v2001_v12, %v2001_v12  ;;  %v7222_v25 = vadd.f32 %v2779_v24, %v2001_v12 }
 0x163   :  { %8063 = vst [vmem:[#allocation37_spill] sm:$0xff] %v7218_v26  ;;  %v7224_v58 = vadd.f32 %v2780_v40, %v2002_v55  ;;  %v2806_v32 = vrot.slane %v2612_v20, %v7115_v4  ;;  %v1831_v1 = vpop.f32.mrb[16].mxu0  ;;  %v7234_v46 = vcombine.high %v7196_v42, %v7196_v42  ;;  %v7238_v24 = vcombine.high %v7202_v45, %v7202_v45 }
 0x164   :  { %8064 = vst [vmem:[#allocation28_spill] sm:$0xff] %v7220_v8  ;;  %8065 = vst [vmem:[#allocation30_spill] sm:$0xff] %v7222_v25  ;;  %v7229_v0 = vadd.f32 %v2781_v53, %v2003_v50  ;;  %v1832_v60 = vadd.f32 %v1831_v1, %v7102_v37  ;;  %v5554_v43 = vpop.f32.mrb[17].mxu0  ;;  %v2617_v23 = vpop.f32.mrb[32].mxu1  ;;  %v2813_v51 = vrot.slane %v2799_v17, %v7115_v4 }
 0x165   :  { %8066 = vst [vmem:[#allocation55_spill] sm:$0xff] %v7224_v58  ;;  %v1834_v19 = vpop.f32.mrb[18].mxu0  ;;  %v2816_v52 = vcombine.high %v2617_v23, %v2617_v23  ;;  %v7242_v20 = vrot.slane %v2617_v23, %v7115_v4  ;;  %v5590_v63 = vpop.f32.mrb[33].mxu1  ;;  %v7245_v37 = vrot.slane %v4741_v35, %v7115_v4  ;;  %v7251_v50 = vcombine.high %v7211_v14, %v7211_v14 }
 0x166   :  { %8067 = vst [vmem:[#allocation52_spill] sm:$0xff] %v7229_v0  ;;  %v2004_v31 = vcombine.high %v1832_v60, %v1832_v60  ;;  %v2011_v12 = vrot.slane %v1832_v60, %v7115_v4  ;;  %v1835_v40 = vadd.f32 %v1834_v19, %v7104_v33  ;;  %v5555_v55 = vpop.f32.mrb[19].mxu0  ;;  %v2620_v53 = vpop.f32.mrb[34].mxu1  ;;  %v2797_v17 = vcombine.high %v2789_v11, %v2789_v11 }
 0x167   :  { %v2798_v1 = vcombine.high %v2796_v28, %v2796_v28  ;;  %v2814_v43 = vcombine.high %v2806_v32, %v2806_v32  ;;  %v2830_v23 = vrot.slane %v2816_v52, %v7115_v4  ;;  %v5591_v63 = vpop.f32.mrb[35].mxu1  ;;  %v2815_v58 = vcombine.high %v2813_v51, %v2813_v51 }
 0x168   :  { %v2018_v35 = vrot.slane %v2004_v31, %v7115_v4  ;;  %v2019_v0 = vcombine.high %v2011_v12, %v2011_v12  ;;  %v7255_v25 = vadd.f32 %v2789_v11, %v2011_v12  ;;  %v2021_v60 = vcombine.high %v1835_v40, %v1835_v40 }
 0x169   :  { %v2028_v33 = vrot.slane %v1835_v40, %v7115_v4  ;;  %v2831_v19 = vcombine.high %v7242_v20, %v7242_v20  ;;  %v2833_v55 = vcombine.high %v2620_v53, %v2620_v53  ;;  %v2832_v11 = vcombine.high %v2830_v23, %v2830_v23 }
 0x16a   :  { %8068 = vst [vmem:[#allocation6_spill] sm:$0xff] %v7255_v25  ;;  %v2020_v26 = vcombine.high %v2018_v35, %v2018_v35  ;;  %v7260_v8 = vadd.f32 %v2797_v17, %v2019_v0  ;;  %v7262_v9 = vadd.f32 %v2796_v28, %v2018_v35  ;;  %v2035_v52 = vrot.slane %v2021_v60, %v7115_v4 }
 0x16b   :  { %v2036_v63 = vcombine.high %v2028_v33, %v2028_v33  ;;  %v7265_v31 = vadd.f32 %v2806_v32, %v2028_v33  ;;  %v2840_v12 = vrot.slane %v2620_v53, %v7115_v4  ;;  %v1839_v25 = vpop.f32.mrb[20].mxu0  ;;  %v2847_v35 = vrot.slane %v2833_v55, %v7115_v4 }
 0x16c   :  { %v7268_v13 = vadd.f32 %v2798_v1, %v2020_v26  ;;  %v2037_v40 = vcombine.high %v2035_v52, %v2035_v52  ;;  %v7270_v18 = vadd.f32 %v2813_v51, %v2035_v52  ;;  %v1840_v59 = vadd.f32 %v1839_v25, %v7106_v6  ;;  %v5558_v0 = vpop.f32.mrb[21].mxu0  ;;  %v2625_v17 = vpop.f32.mrb[36].mxu1 }
 0x16d   :  { %8069 = vst [vmem:[#allocation7_spill] sm:$0xff] %v7265_v31  ;;  %v7273_v28 = vadd.f32 %v2814_v43, %v2036_v63  ;;  %v1842_v60 = vpop.f32.mrb[22].mxu0  ;;  %v2850_v32 = vcombine.high %v2625_v17, %v2625_v17  ;;  %v7277_v33 = vrot.slane %v2625_v17, %v7115_v4  ;;  %v5594_v53 = vpop.f32.mrb[37].mxu1  ;;  %v2848_v52 = vcombine.high %v2840_v12, %v2840_v12 }
 0x16e   :  { %8070 = vst [vmem:[#allocation8_spill] sm:$0xff] %v7270_v18  ;;  %v7279_v31 = vadd.f32 %v2815_v58, %v2037_v40  ;;  %v2038_v26 = vcombine.high %v1840_v59, %v1840_v59  ;;  %v2045_v51 = vrot.slane %v1840_v59, %v7115_v4  ;;  %v1843_v1 = vadd.f32 %v1842_v60, %v7108_v3  ;;  %v5559_v6 = vpop.f32.mrb[23].mxu0  ;;  %v2628_v25 = vpop.f32.mrb[38].mxu1 }
 0x16f   :  { %8071 = vst [vmem:[#allocation9_spill] sm:$0xff] %v7273_v28  ;;  %v2864_v43 = vrot.slane %v2850_v32, %v7115_v4  ;;  %v2867_v63 = vcombine.high %v2628_v25, %v2628_v25  ;;  %v7285_v55 = vrot.slane %v2628_v25, %v7115_v4  ;;  %v5595_v0 = vpop.f32.mrb[39].mxu1  ;;  %v2849_v59 = vcombine.high %v2847_v35, %v2847_v35 }
 0x170   :  { %8072 = vst [vmem:[#allocation32_spill] sm:$0xff] %v7279_v31  ;;  %v2052_v17 = vrot.slane %v2038_v26, %v7115_v4  ;;  %v2053_v53 = vcombine.high %v2045_v51, %v2045_v51  ;;  %v7289_v58 = vadd.f32 %v7242_v20, %v2045_v51  ;;  %v2055_v40 = vcombine.high %v1843_v1, %v1843_v1 }
 0x171   :  { %v2062_v3 = vrot.slane %v1843_v1, %v7115_v4  ;;  %v2865_v60 = vcombine.high %v7277_v33, %v7277_v33  ;;  %v7295_v32 = vrot.slane %v2867_v63, %v7115_v4  ;;  %v2866_v51 = vcombine.high %v2864_v43, %v2864_v43 }
 0x172   :  { %8073 = vst [vmem:[#allocation20_spill] sm:$0xff] %v7289_v58  ;;  %v2054_v6 = vcombine.high %v2052_v17, %v2052_v17  ;;  %v7297_v25 = vadd.f32 %v2831_v19, %v2053_v53  ;;  %v7299_v0 = vadd.f32 %v2830_v23, %v2052_v17  ;;  %v2069_v26 = vrot.slane %v2055_v40, %v7115_v4 }
 0x173   :  { %v2070_v31 = vcombine.high %v2062_v3, %v2062_v3  ;;  %v7302_v20 = vadd.f32 %v2840_v12, %v2062_v3  ;;  %v2882_v1 = vcombine.high %v7285_v55, %v7285_v55  ;;  %v1847_v58 = vpop.f32.mrb[24].mxu0  ;;  %v2883_v12 = vcombine.high %v7295_v32, %v7295_v32 }
 0x174   :  { %8074 = vst [vmem:[#allocation54_spill] sm:$0xff] %v7297_v25  ;;  %8075 = vst [vmem:[#allocation59_spill] sm:$0xff] %v7299_v0  ;;  %v7306_v18 = vadd.f32 %v2832_v11, %v2054_v6  ;;  %v2071_v28 = vcombine.high %v2069_v26, %v2069_v26  ;;  %v7308_v63 = vadd.f32 %v2847_v35, %v2069_v26  ;;  %v3595_v53 = vpop.f32.mrb[40].mxu1  ;;  %v5562_v23 = vpop.f32.mrb[25].mxu0 }
 0x175   :  { %8076 = vst [vmem:[#allocation57_spill] sm:$0xff] %v7302_v20  ;;  %v1848_v19 = vadd.f32 %v1847_v58, %v7110_v15  ;;  %v7311_v17 = vadd.f32 %v2848_v52, %v2070_v31  ;;  %v3664_v40 = vcombine.high %v3595_v53, %v3595_v53  ;;  %v3671_v3 = vrot.slane %v3595_v53, %v7115_v4  ;;  %v5602_v20 = vpop.f32.mrb[41].mxu1  ;;  %v1850_v0 = vpop.f32.mrb[26].mxu0 }
 0x176   :  { %8077 = vst [vmem:[#allocation19_spill] sm:$0xff] %v7308_v63  ;;  %v7316_v25 = vadd.f32 %v2849_v59, %v2071_v28  ;;  %v1851_v6 = vadd.f32 %v1850_v0, %v7112_v38  ;;  %v3598_v15 = vpop.f32.mrb[42].mxu1  ;;  %v5563_v58 = vpop.f32.mrb[27].mxu0 }
 0x177   :  { %v2072_v11 = vcombine.high %v1848_v19, %v1848_v19  ;;  %v2079_v35 = vrot.slane %v1848_v19, %v7115_v4  ;;  %v3678_v31 = vrot.slane %v3664_v40, %v7115_v4  ;;  %v3679_v52 = vcombine.high %v3671_v3, %v3671_v3  ;;  %v5603_v63 = vpop.f32.mrb[43].mxu1 }
 0x178   :  { %8078 = vst [vmem:[#allocation56_spill] sm:$0xff] %v7316_v25  ;;  %v3958_v26 = vadd.f32 %v3671_v3, %v7123_v54  ;;  %v3681_v23 = vcombine.high %v3598_v15, %v3598_v15  ;;  %v2089_v59 = vcombine.high %v1851_v6, %v1851_v6  ;;  %v2096_v0 = vrot.slane %v1851_v6, %v7115_v4 }
 0x179   :  { %v2086_v53 = vrot.slane %v2072_v11, %v7115_v4  ;;  %v2087_v20 = vcombine.high %v2079_v35, %v2079_v35  ;;  %v7324_v28 = vadd.f32 %v7277_v33, %v2079_v35  ;;  %v3680_v25 = vcombine.high %v3678_v31, %v3678_v31 }
 0x17a   :  { %v3959_v19 = vadd.f32 %v3679_v52, %v7126_v61  ;;  %v3960_v38 = vadd.f32 %v3678_v31, %v7128_v16  ;;  %v2103_v63 = vrot.slane %v2089_v59, %v7115_v4  ;;  %v2104_v11 = vcombine.high %v2096_v0, %v2096_v0 }
 0x17b   :  { %v2088_v40 = vcombine.high %v2086_v53, %v2086_v53  ;;  %v7329_v58 = vadd.f32 %v2865_v60, %v2087_v20  ;;  %v7331_v54 = vadd.f32 %v2864_v43, %v2086_v53  ;;  %v3961_v3 = vadd.f32 %v3680_v25, %v7134_v30  ;;  %v4301_v61 = vpop.f32.mrb[28].mxu0 }
 0x17c   :  { %v7336_v33 = vadd.f32 %v7285_v55, %v2096_v0  ;;  %v3688_v35 = vrot.slane %v3598_v15, %v7115_v4  ;;  %v2105_v16 = vcombine.high %v2103_v63, %v2103_v63  ;;  %v7342_v6 = vadd.f32 %v7295_v32, %v2103_v63  ;;  %v3603_v60 = vpop.f32.mrb[44].mxu1  ;;  %v5634_v31 = vpop.f32.mrb[29].mxu0 }
 0x17d   :  { %v7339_v52 = vadd.f32 %v2866_v51, %v2088_v40  ;;  %v3695_v43 = vrot.slane %v3681_v23, %v7115_v4  ;;  %v7345_v53 = vadd.f32 %v2882_v1, %v2104_v11  ;;  %v3698_v55 = vcombine.high %v3603_v60, %v3603_v60  ;;  %v5606_v20 = vpop.f32.mrb[45].mxu1  ;;  %v4304_v59 = vpop.f32.mrb[30].mxu0 }
 0x17e   :  { %v3696_v30 = vcombine.high %v3688_v35, %v3688_v35  ;;  %v3962_v25 = vadd.f32 %v3688_v35, %v7131_v41  ;;  %v7348_v15 = vadd.f32 %v2883_v12, %v2105_v16  ;;  %v3705_v32 = vrot.slane %v3603_v60, %v7115_v4  ;;  %v3606_v40 = vpop.f32.mrb[46].mxu1  ;;  %v5635_v63 = vpop.f32.mrb[31].mxu0 }
 0x17f   :  { %8079 = vst [vmem:[#allocation58_spill] sm:$0xff] %v7345_v53  ;;  %v3697_v51 = vcombine.high %v3695_v43, %v3695_v43  ;;  %v3964_v0 = vadd.f32 %v3695_v43, %v7136_v2  ;;  %v3712_v1 = vrot.slane %v3698_v55, %v7115_v4  ;;  %v4370_v11 = vcombine.high %v4301_v61, %v4301_v61  ;;  %v5607_v41 = vpop.f32.mrb[47].mxu1 }
 0x180   :  { %8080 = vst [vmem:[#allocation60_spill] sm:$0xff] %v7348_v15  ;;  %v3963_v23 = vadd.f32 %v3696_v30, %v7138_v49  ;;  %v4377_v31 = vrot.slane %v4301_v61, %v7115_v4  ;;  %v3713_v20 = vcombine.high %v3705_v32, %v3705_v32  ;;  %v7357_v12 = vadd.f32 %v3705_v32, %v7147_v10 }
 0x181   :  { %v3965_v35 = vadd.f32 %v3697_v51, %v7142_v44  ;;  %v3715_v16 = vcombine.high %v3606_v40, %v3606_v40  ;;  %v3714_v2 = vcombine.high %v3712_v1, %v3712_v1  ;;  %v7360_v43 = vadd.f32 %v3712_v1, %v7152_v22 }
 0x182   :  { %v4384_v60 = vrot.slane %v4370_v11, %v7115_v4  ;;  %v4385_v49 = vcombine.high %v4377_v31, %v4377_v31  ;;  %v7364_v30 = vadd.f32 %v3713_v20, %v7150_v56  ;;  %v4664_v55 = vadd.f32 %v4377_v31, %v3958_v26 }
 0x183   :  { %v3722_v61 = vrot.slane %v3606_v40, %v7115_v4  ;;  %v3729_v44 = vrot.slane %v3715_v16, %v7115_v4  ;;  %v7369_v51 = vadd.f32 %v3714_v2, %v7158_v29  ;;  %v4309_v41 = vpop.f32.mrb[32].mxu0 }
 0x184   :  { %v4386_v10 = vcombine.high %v4384_v60, %v4384_v60  ;;  %v4665_v32 = vadd.f32 %v4385_v49, %v3959_v19  ;;  %v4666_v63 = vadd.f32 %v4384_v60, %v3960_v38  ;;  %v4764_v22 = vadd.f32 %v7196_v42, %v4664_v55  ;;  %v3611_v56 = vpop.f32.mrb[48].mxu1  ;;  %v5638_v26 = vpop.f32.mrb[33].mxu0 }
 0x185   :  { %v3730_v1 = vcombine.high %v3722_v61, %v3722_v61  ;;  %v3731_v11 = vcombine.high %v3729_v44, %v3729_v44  ;;  %v7373_v15 = vadd.f32 %v3722_v61, %v7155_v21  ;;  %v7378_v29 = vadd.f32 %v3729_v44, %v7160_v5  ;;  %v5610_v19 = vpop.f32.mrb[49].mxu1  ;;  %v7380_v38 = vpop.f32.mrb[34].mxu0 }
 0x186   :  { %v4667_v31 = vadd.f32 %v4386_v10, %v3961_v3  ;;  %v4765_v40 = vadd.f32 %v7234_v46, %v4665_v32  ;;  %v4766_v20 = vadd.f32 %v7202_v45, %v4666_v63  ;;  %v4387_v21 = vcombine.high %v4304_v59, %v4304_v59  ;;  %v3614_v3 = vpop.f32.mrb[50].mxu1  ;;  %v5639_v49 = vpop.f32.mrb[35].mxu0 }
 0x187   :  { %v7383_v16 = vadd.f32 %v3730_v1, %v7165_v57  ;;  %v7386_v2 = vadd.f32 %v3731_v11, %v7169_v39  ;;  %v4394_v60 = vrot.slane %v4304_v59, %v7115_v4  ;;  %v3732_v10 = vcombine.high %v3611_v56, %v3611_v56  ;;  %v5611_v44 = vpop.f32.mrb[51].mxu1 }
 0x188   :  { %v4767_v55 = vadd.f32 %v7238_v24, %v4667_v31  ;;  %v4876_v61 = vcombine.low %v4764_v22, %v4765_v40  ;;  %v3739_v5 = vrot.slane %v3611_v56, %v7115_v4  ;;  %v4401_v32 = vrot.slane %v4387_v21, %v7115_v4 }
 0x189   :  { %v4402_v63 = vcombine.high %v4394_v60, %v4394_v60  ;;  %v4668_v57 = vadd.f32 %v4394_v60, %v3962_v25  ;;  %v4404_v1 = vcombine.high %v4309_v41, %v4309_v41  ;;  %v3746_v59 = vrot.slane %v3732_v10, %v7115_v4 }
 0x18a   :  { %v4877_v26 = vcombine.low %v4766_v20, %v4767_v55  ;;  %v4884_v39 = vrot.slane %v4876_v61, %v7115_v4  ;;  %v3747_v11 = vcombine.high %v3739_v5, %v3739_v5  ;;  %v4403_v19 = vcombine.high %v4401_v32, %v4401_v32 }
 0x18b   :  { %v4669_v49 = vadd.f32 %v4402_v63, %v3963_v23  ;;  %v4670_v31 = vadd.f32 %v4401_v32, %v3964_v0  ;;  %v4768_v22 = vadd.f32 %v7211_v14, %v4668_v57  ;;  %v3748_v40 = vcombine.high %v3746_v59, %v3746_v59  ;;  %v7402_v20 = vpop.f32.mrb[36].mxu0 }
 0x18c   :  { %v4891_v56 = vrot.slane %v4877_v26, %v7115_v4  ;;  %v7397_v21 = vadd.f32 %v3739_v5, %v7174_v48  ;;  %v7400_v25 = vadd.f32 %v3747_v11, %v7177_v34  ;;  %v4671_v60 = vadd.f32 %v4403_v19, %v3965_v35  ;;  %v7409_v23 = vpop.f32.mrb[52].mxu1  ;;  %v5642_v10 = vpop.f32.mrb[37].mxu0 }
 0x18d   :  { %v4769_v55 = vadd.f32 %v7251_v50, %v4669_v49  ;;  %v4770_v61 = vadd.f32 %v7245_v37, %v4670_v31  ;;  %v7407_v0 = vadd.f32 %v3746_v59, %v7179_v36  ;;  %v7412_v48 = vadd.f32 %v3748_v40, %v7185_v62  ;;  %v5614_v32 = vpop.f32.mrb[53].mxu1  ;;  %v7416_v35 = vpop.f32.mrb[38].mxu0 }
 0x18e   :  { %v4892_v44 = vcombine.low %v4884_v39, %v4891_v56  ;;  %v4411_v34 = vrot.slane %v4309_v41, %v7115_v4  ;;  %v4418_v5 = vrot.slane %v4404_v1, %v7115_v4  ;;  %v4771_v36 = vadd.f32 %v7196_v42, %v4671_v60  ;;  %v7420_v59 = vpop.f32.mrb[54].mxu1  ;;  %v5643_v11 = vpop.f32.mrb[39].mxu0 }
 0x18f   :  { %v4893_v63 = vcombine.low %v4768_v22, %v4769_v55  ;;  %v4907_v57 = vrot.slane %v4770_v61, %v7115_v4  ;;  %v3749_v26 = vcombine.high %v3614_v3, %v3614_v3  ;;  %v5615_v49 = vpop.f32.mrb[55].mxu1  ;;  %v3756_v31 = vrot.slane %v3614_v3, %v7115_v4 }
 0x190   :  { %v4419_v39 = vcombine.high %v4411_v34, %v4411_v34  ;;  %v4420_v19 = vcombine.high %v4418_v5, %v4418_v5  ;;  %v4672_v62 = vadd.f32 %v4411_v34, %v7357_v12  ;;  %v4674_v41 = vadd.f32 %v4418_v5, %v7360_v43 }
 0x191   :  { %v4900_v1 = vrot.slane %v4893_v63, %v7115_v4  ;;  %v3763_v22 = vrot.slane %v3749_v26, %v7115_v4  ;;  %v4421_v56 = vcombine.high %v7380_v38, %v7380_v38  ;;  %v3764_v43 = vcombine.high %v3756_v31, %v3756_v31  ;;  %v8081_v26 = vld [vmem:[#allocation34_spill] sm:$0xff] }
 0x192   :  { %v4673_v40 = vadd.f32 %v4419_v39, %v7364_v30  ;;  %v4675_v60 = vadd.f32 %v4420_v19, %v7369_v51  ;;  %v4772_v55 = vadd.f32 %v7234_v46, %v4672_v62  ;;  %v4774_v12 = vadd.f32 %v7238_v24, %v4674_v41 }
 0x193   :  { %v4908_v61 = vcombine.low %v4900_v1, %v4907_v57  ;;  %v3765_v10 = vcombine.high %v3763_v22, %v3763_v22  ;;  %v7434_v34 = vadd.f32 %v3756_v31, %v7182_v7  ;;  %v7438_v32 = vadd.f32 %v3763_v22, %v7187_v27  ;;  %v7442_v51 = vpop.f32.mrb[40].mxu0 }
 0x194   :  { %v4773_v3 = vadd.f32 %v7202_v45, %v4673_v40  ;;  %v4909_v5 = vcombine.low %v4771_v36, %v4772_v55  ;;  %v4428_v30 = vrot.slane %v7380_v38, %v7115_v4  ;;  %v7446_v57 = vadd.f32 %v3764_v43, %v7192_v47  ;;  %v7452_v39 = vpop.f32.mrb[56].mxu1  ;;  %v5646_v36 = vpop.f32.mrb[41].mxu0 }
 0x195   :  { %v5157_v63 = vsel %vm5156_vm0, %v4908_v61, -inf  ;;  %v7449_v11 = vadd.f32 %v3765_v10, %v8081_v26  ;;  %v4435_v7 = vrot.slane %v4421_v56, %v7115_v4  ;;  %v5618_v41 = vpop.f32.mrb[57].mxu1  ;;  %v7455_v49 = vpop.f32.mrb[42].mxu0  ;;  %v4775_v22 = vadd.f32 %v7211_v14, %v4675_v60  ;;  %v8082_v36 = vld [vmem:[#allocation33_spill] sm:$0xff] }
 0x196   :  { %v5158_v27 = vmax.f32 %v4892_v44, %v5157_v63  ;;  %v4910_v19 = vcombine.low %v4773_v3, %v4774_v12  ;;  %v4917_v62 = vrot.slane %v4909_v5, %v7115_v4  ;;  %v4436_v38 = vcombine.high %v4428_v30, %v4428_v30  ;;  %v7460_v40 = vpop.f32.mrb[58].mxu1  ;;  %v5647_v56 = vpop.f32.mrb[43].mxu0 }
 0x197   :  { %v4437_v1 = vcombine.high %v4435_v7, %v4435_v7  ;;  %v4676_v47 = vadd.f32 %v4428_v30, %v7373_v15  ;;  %v4678_v31 = vadd.f32 %v4435_v7, %v7378_v29  ;;  %v3766_v61 = vcombine.high %v7409_v23, %v7409_v23  ;;  %v5619_v43 = vpop.f32.mrb[59].mxu1 }
 0x198   :  { %v5159_v55 = vrot.slane %v5158_v27, 4  ;;  %v4924_v44 = vrot.slane %v4910_v19, %v7115_v4  ;;  %v4677_v12 = vadd.f32 %v4436_v38, %v7383_v16  ;;  %v3773_v60 = vrot.slane %v7409_v23, %v7115_v4 }
 0x199   :  { %v4679_v10 = vadd.f32 %v4437_v1, %v7386_v2  ;;  %v4776_v15 = vadd.f32 %v7251_v50, %v4676_v47  ;;  %v4778_v29 = vadd.f32 %v7196_v42, %v4678_v31  ;;  %v3780_v63 = vrot.slane %v3766_v61, %v7115_v4  ;;  %v8083_v1 = vld [vmem:[#allocation38_spill] sm:$0xff]  ;;  %v8084_v31 = vld [vmem:[#allocation36_spill] sm:$0xff] }
 0x19a   :  { %v5160_v3 = vmax.f32 %v5158_v27, %v5159_v55  ;;  %v4925_v5 = vcombine.low %v4917_v62, %v4924_v44  ;;  %v4777_v30 = vadd.f32 %v7245_v37, %v4677_v12  ;;  %v3781_v7 = vcombine.high %v3773_v60, %v3773_v60  ;;  %v8085_v61 = vld [vmem:[#allocation28_spill] sm:$0xff] }
 0x19b   :  { %v4779_v16 = vadd.f32 %v7234_v46, %v4679_v10  ;;  %v4926_v26 = vcombine.low %v4775_v22, %v4776_v15  ;;  %v7475_v19 = vadd.f32 %v3773_v60, %v8082_v36  ;;  %v3782_v41 = vcombine.high %v3780_v63, %v3780_v63  ;;  %v7481_v23 = vpop.f32.mrb[44].mxu0 }
 0x19c   :  { %v5161_v2 = vrot.slane %v5160_v3, 2  ;;  %v4940_v38 = vrot.slane %v4777_v30, %v7115_v4  ;;  %v7479_v47 = vadd.f32 %v3780_v63, %v8083_v1  ;;  %v7485_v56 = vadd.f32 %v3781_v7, %v8084_v31  ;;  %v7489_v55 = vpop.f32.mrb[60].mxu1  ;;  %v5650_v44 = vpop.f32.mrb[45].mxu0 }
 0x19d   :  { %v4933_v27 = vrot.slane %v4926_v26, %v7115_v4  ;;  %v4942_v62 = vcombine.low %v4778_v29, %v4779_v16  ;;  %v4438_v22 = vcombine.high %v7402_v20, %v7402_v20  ;;  %v7492_v43 = vadd.f32 %v3782_v41, %v8085_v61  ;;  %v5622_v29 = vpop.f32.mrb[61].mxu1  ;;  %v7498_v60 = vpop.f32.mrb[46].mxu0 }
 0x19e   :  { %v5162_v12 = vmax.f32 %v5160_v3, %v5161_v2  ;;  %v4445_v10 = vrot.slane %v7402_v20, %v7115_v4  ;;  %v3783_v15 = vcombine.high %v7420_v59, %v7420_v59  ;;  %v3790_v3 = vrot.slane %v7420_v59, %v7115_v4  ;;  %v7506_v26 = vpop.f32.mrb[62].mxu1  ;;  %v5651_v7 = vpop.f32.mrb[47].mxu0 }
 0x19f   :  { %v4941_v30 = vcombine.low %v4933_v27, %v4940_v38  ;;  %v7501_v63 = vrot.slane %v4942_v62, %v7115_v4  ;;  %v4452_v16 = vrot.slane %v4438_v22, %v7115_v4  ;;  %v5623_v1 = vpop.f32.mrb[63].mxu1 }
 0x1a0   :  { %v5163_v36 = vrot.slane %v5162_v12, 1  ;;  %v4453_v20 = vcombine.high %v4445_v10, %v4445_v10  ;;  %v4680_v2 = vadd.f32 %v4445_v10, %v7397_v21  ;;  %v3797_v41 = vrot.slane %v3783_v15, %v7115_v4  ;;  %v8087_v15 = vld [vmem:[#allocation37_spill] sm:$0xff] }
 0x1a1   :  { %v5165_v38 = vsel %vm5156_vm0, %v4941_v30, -inf  ;;  %v4454_v27 = vcombine.high %v4452_v16, %v4452_v16  ;;  %v4682_v62 = vadd.f32 %v4452_v16, %v7407_v0  ;;  %v3798_v31 = vcombine.high %v3790_v3, %v3790_v3  ;;  %v8088_v0 = vld [vmem:[#allocation55_spill] sm:$0xff] }
 0x1a2   :  { %v7512_v22 = vmax.f32 %v5162_v12, %v5163_v36  ;;  %v5166_v44 = vmax.f32 %v4925_v5, %v5165_v38  ;;  %v4681_v59 = vadd.f32 %v4453_v20, %v7400_v25  ;;  %v4780_v61 = vadd.f32 %v7202_v45, %v4680_v2  ;;  %v8089_v12 = vld [vmem:[#allocation30_spill] sm:$0xff] }
 0x1a3   :  { %v4683_v29 = vadd.f32 %v4454_v27, %v7412_v48  ;;  %v4782_v21 = vadd.f32 %v7211_v14, %v4682_v62  ;;  %v3799_v10 = vcombine.high %v3797_v41, %v3797_v41  ;;  %v7519_v7 = vadd.f32 %v3790_v3, %v8087_v15  ;;  %v7528_v25 = vpop.f32.mrb[48].mxu0  ;;  %v8090_v48 = vld [vmem:[#allocation52_spill] sm:$0xff] }
 0x1a4   :  { %8086 = vst [vmem:[#allocation35_spill] sm:$0xff] %v7512_v22  ;;  %v5167_v30 = vrot.slane %v5166_v44, 4  ;;  %v4781_v1 = vadd.f32 %v7238_v24, %v4681_v59  ;;  %v7523_v16 = vadd.f32 %v3798_v31, %v8088_v0  ;;  %v7526_v5 = vadd.f32 %v3797_v41, %v8089_v12  ;;  %v7538_v38 = vpop.f32.mrb[64].mxu1  ;;  %v5654_v27 = vpop.f32.mrb[49].mxu0 }
 0x1a5   :  { %v4783_v36 = vadd.f32 %v7251_v50, %v4683_v29  ;;  %v7532_v20 = vadd.f32 %v3799_v10, %v8090_v48  ;;  %v4455_v3 = vcombine.high %v7416_v35, %v7416_v35  ;;  %v4462_v2 = vrot.slane %v7416_v35, %v7115_v4  ;;  %v5626_v29 = vpop.f32.mrb[65].mxu1  ;;  %v7544_v10 = vpop.f32.mrb[50].mxu0 }
 0x1a6   :  { %v5168_v62 = vmax.f32 %v5166_v44, %v5167_v30  ;;  %v4943_v31 = vcombine.low %v4780_v61, %v4781_v1  ;;  %v3800_v41 = vcombine.high %v7452_v39, %v7452_v39  ;;  %v3807_v59 = vrot.slane %v7452_v39, %v7115_v4  ;;  %8091 = vst [vmem:[#allocation22_spill] sm:$0xff] %v7544_v10  ;;  %v7548_v48 = vpop.f32.mrb[66].mxu1  ;;  %v5655_v27 = vpop.f32.mrb[51].mxu0 }
 0x1a7   :  { %v4959_v15 = vcombine.low %v4782_v21, %v4783_v36  ;;  %v4469_v0 = vrot.slane %v4455_v3, %v7115_v4  ;;  %v4470_v12 = vcombine.high %v4462_v2, %v4462_v2  ;;  %v4684_v35 = vadd.f32 %v4462_v2, %v7434_v34  ;;  %v5627_v22 = vpop.f32.mrb[67].mxu1 }
 0x1a8   :  { %v5169_v44 = vrot.slane %v5168_v62, 2  ;;  %v4957_v61 = vrot.slane %v4943_v31, %v7115_v4  ;;  %v3814_v30 = vrot.slane %v3800_v41, %v7115_v4  ;;  %v3815_v1 = vcombine.high %v3807_v59, %v3807_v59 }
 0x1a9   :  { %v4471_v39 = vcombine.high %v4469_v0, %v4469_v0  ;;  %v4685_v29 = vadd.f32 %v4470_v12, %v7446_v57  ;;  %v4686_v21 = vadd.f32 %v4469_v0, %v7438_v32  ;;  %v4784_v36 = vadd.f32 %v7245_v37, %v4684_v35  ;;  %v8092_v57 = vld [vmem:[#allocation6_spill] sm:$0xff] }
 0x1aa   :  { %v5170_v3 = vmax.f32 %v5168_v62, %v5169_v44  ;;  %v4958_v34 = vcombine.low %v7501_v63, %v4957_v61  ;;  %v4966_v2 = vrot.slane %v4959_v15, %v7115_v4  ;;  %v3816_v27 = vcombine.high %v3814_v30, %v3814_v30 }
 0x1ab   :  { %v4687_v10 = vadd.f32 %v4471_v39, %v7449_v11  ;;  %v4785_v31 = vadd.f32 %v7196_v42, %v4685_v29  ;;  %v4786_v41 = vadd.f32 %v7234_v46, %v4686_v21  ;;  %v4973_v22 = vrot.slane %v4784_v36, %v7115_v4  ;;  %v7570_v62 = vpop.f32.mrb[52].mxu0 }
 0x1ac   :  { %v5171_v53 = vrot.slane %v5170_v3, 1  ;;  %v7562_v12 = vadd.f32 %v3807_v59, %v8092_v57  ;;  %v7565_v32 = vadd.f32 %v3815_v1, %v7260_v8  ;;  %v7568_v63 = vadd.f32 %v3814_v30, %v7262_v9  ;;  %v5658_v44 = vpop.f32.mrb[53].mxu0 }
 0x1ad   :  { %v4974_v15 = vcombine.low %v4966_v2, %v4973_v22  ;;  %v4975_v11 = vcombine.low %v4785_v31, %v4786_v41  ;;  %v7573_v0 = vadd.f32 %v3816_v27, %v7268_v13  ;;  %v4472_v35 = vcombine.high %v7442_v51, %v7442_v51  ;;  %v7584_v30 = vpop.f32.mrb[54].mxu0  ;;  %v8093_v31 = vld [vmem:[#allocation7_spill] sm:$0xff]  ;;  %v8095_v44 = vld [vmem:[#allocation8_spill] sm:$0xff] }
 0x1ae   :  { %v7577_v61 = vmax.f32 %v5170_v3, %v5171_v53  ;;  %v4479_v8 = vrot.slane %v7442_v51, %v7115_v4  ;;  %v4787_v59 = vadd.f32 %v7202_v45, %v4687_v10  ;;  %v3817_v9 = vcombine.high %v7460_v40, %v7460_v40  ;;  %v5659_v29 = vpop.f32.mrb[55].mxu0 }
 0x1af   :  { %v4983_v1 = vrot.slane %v4975_v11, %v7115_v4  ;;  %v5173_v13 = vsel %vm5156_vm0, %v4974_v15, -inf  ;;  %v4486_v39 = vrot.slane %v4472_v35, %v7115_v4  ;;  %v3824_v53 = vrot.slane %v7460_v40, %v7115_v4 }
 0x1b0   :  { %v5174_v21 = vmax.f32 %v4958_v34, %v5173_v13  ;;  %v4487_v36 = vcombine.high %v4479_v8, %v4479_v8  ;;  %v4688_v51 = vadd.f32 %v4479_v8, %v7475_v19  ;;  %v3831_v10 = vrot.slane %v3817_v9, %v7115_v4  ;;  %v8094_v19 = vld [vmem:[#allocation9_spill] sm:$0xff] }
 0x1b1   :  { %v4488_v3 = vcombine.high %v4486_v39, %v4486_v39  ;;  %v4690_v2 = vadd.f32 %v4486_v39, %v7479_v47  ;;  %v3832_v27 = vcombine.high %v3824_v53, %v3824_v53  ;;  %v7595_v41 = vadd.f32 %v3824_v53, %v8093_v31  ;;  %v8096_v39 = vld [vmem:[#allocation32_spill] sm:$0xff] }
 0x1b2   :  { %v5175_v22 = vrot.slane %v5174_v21, 4  ;;  %v4689_v57 = vadd.f32 %v4487_v36, %v7485_v56  ;;  %v4788_v15 = vadd.f32 %v7238_v24, %v4688_v51  ;;  %v3833_v40 = vcombine.high %v3831_v10, %v3831_v10 }
 0x1b3   :  { %v4691_v34 = vadd.f32 %v4488_v3, %v7492_v43  ;;  %v4790_v11 = vadd.f32 %v7251_v50, %v4690_v2  ;;  %v7602_v35 = vadd.f32 %v3832_v27, %v8094_v19  ;;  %v7605_v8 = vadd.f32 %v3831_v10, %v8095_v44 }
 0x1b4   :  { %v5176_v47 = vmax.f32 %v5174_v21, %v5175_v22  ;;  %v4789_v9 = vadd.f32 %v7211_v14, %v4689_v57  ;;  %v4976_v13 = vcombine.low %v4787_v59, %v4788_v15  ;;  %v7609_v53 = vadd.f32 %v3833_v40, %v8096_v39 }
 0x1b5   :  { %v4791_v56 = vadd.f32 %v7245_v37, %v4691_v34  ;;  %v4489_v43 = vcombine.high %v7455_v49, %v7455_v49  ;;  %v4496_v29 = vrot.slane %v7455_v49, %v7115_v4  ;;  %v3834_v36 = vcombine.high %v7489_v55, %v7489_v55 }
 0x1b6   :  { %v5177_v51 = vrot.slane %v5176_v47, 2  ;;  %v4990_v21 = vrot.slane %v4976_v13, %v7115_v4  ;;  %v4992_v10 = vcombine.low %v4789_v9, %v4790_v11  ;;  %v3841_v59 = vrot.slane %v7489_v55, %v7115_v4 }
 0x1b7   :  { %v5006_v3 = vrot.slane %v4791_v56, %v7115_v4  ;;  %v4503_v2 = vrot.slane %v4489_v43, %v7115_v4  ;;  %v4504_v27 = vcombine.high %v4496_v29, %v4496_v29  ;;  %v4692_v31 = vadd.f32 %v4496_v29, %v7519_v7 }
 0x1b8   :  { %v5178_v22 = vmax.f32 %v5176_v47, %v5177_v51  ;;  %v4991_v57 = vcombine.low %v4983_v1, %v4990_v21  ;;  %v4999_v49 = vrot.slane %v4992_v10, %v7115_v4  ;;  %v3848_v15 = vrot.slane %v3834_v36, %v7115_v4  ;;  %v8097_v47 = vld [vmem:[#allocation20_spill] sm:$0xff]  ;;  %v8099_v36 = vld [vmem:[#allocation59_spill] sm:$0xff] }
 0x1b9   :  { %v4505_v40 = vcombine.high %v4503_v2, %v4503_v2  ;;  %v4693_v34 = vadd.f32 %v4504_v27, %v7523_v16  ;;  %v4694_v11 = vadd.f32 %v4503_v2, %v7526_v5  ;;  %v4792_v55 = vadd.f32 %v7196_v42, %v4692_v31  ;;  %v8098_v5 = vld [vmem:[#allocation54_spill] sm:$0xff] }
 0x1ba   :  { %v5179_v19 = vrot.slane %v5178_v22, 1  ;;  %v5007_v44 = vcombine.low %v4999_v49, %v5006_v3  ;;  %v3849_v9 = vcombine.high %v3841_v59, %v3841_v59  ;;  %v3850_v13 = vcombine.high %v3848_v15, %v3848_v15 }
 0x1bb   :  { %v4695_v39 = vadd.f32 %v4505_v40, %v7532_v20  ;;  %v4793_v7 = vadd.f32 %v7234_v46, %v4693_v34  ;;  %v4794_v1 = vadd.f32 %v7202_v45, %v4694_v11  ;;  %v7633_v56 = vadd.f32 %v3841_v59, %v8097_v47 }
 0x1bc   :  { %v7635_v43 = vmax.f32 %v5178_v22, %v5179_v19  ;;  %v5181_v16 = vsel %vm5156_vm0, %v5007_v44, -inf  ;;  %v7639_v29 = vadd.f32 %v3849_v9, %v8098_v5  ;;  %v7642_v51 = vadd.f32 %v3848_v15, %v8099_v36  ;;  %v8100_v44 = vld [vmem:[#allocation57_spill] sm:$0xff] }
 0x1bd   :  { %v5182_v21 = vmax.f32 %v4991_v57, %v5181_v16  ;;  %v4795_v20 = vadd.f32 %v7238_v24, %v4695_v39  ;;  %v5008_v10 = vcombine.low %v4792_v55, %v4793_v7  ;;  %v7646_v3 = vadd.f32 %v3850_v13, %v7306_v18 }
 0x1be   :  { %v4506_v59 = vcombine.high %v7481_v23, %v7481_v23  ;;  %v4513_v2 = vrot.slane %v7481_v23, %v7115_v4  ;;  %v3851_v27 = vcombine.high %v7506_v26, %v7506_v26  ;;  %v3858_v31 = vrot.slane %v7506_v26, %v7115_v4 }
 0x1bf   :  { %v5183_v22 = vrot.slane %v5182_v21, 4  ;;  %v5009_v57 = vcombine.low %v4794_v1, %v4795_v20  ;;  %v5016_v49 = vrot.slane %v5008_v10, %v7115_v4  ;;  %v4523_v18 = vcombine.high %v7498_v60, %v7498_v60  ;;  %v8101_v20 = vld [vmem:[#allocation19_spill] sm:$0xff] }
 0x1c0   :  { %v4520_v15 = vrot.slane %v4506_v59, %v7115_v4  ;;  %v4521_v40 = vcombine.high %v4513_v2, %v4513_v2  ;;  %v4696_v34 = vadd.f32 %v4513_v2, %v7562_v12  ;;  %v3865_v23 = vrot.slane %v3851_v27, %v7115_v4 }
 0x1c1   :  { %v5184_v11 = vmax.f32 %v5182_v21, %v5183_v22  ;;  %v5023_v55 = vrot.slane %v5009_v57, %v7115_v4  ;;  %v3866_v19 = vcombine.high %v3858_v31, %v3858_v31  ;;  %v7664_v26 = vadd.f32 %v3858_v31, %v8100_v44 }
 0x1c2   :  { %v4522_v9 = vcombine.high %v4520_v15, %v4520_v15  ;;  %v4697_v13 = vadd.f32 %v4521_v40, %v7565_v32  ;;  %v4698_v39 = vadd.f32 %v4520_v15, %v7568_v63  ;;  %v4796_v7 = vadd.f32 %v7211_v14, %v4696_v34  ;;  %v8102_v63 = vld [vmem:[#allocation56_spill] sm:$0xff] }
 0x1c3   :  { %v5185_v1 = vrot.slane %v5184_v11, 2  ;;  %v5024_v47 = vcombine.low %v5016_v49, %v5023_v55  ;;  %v3867_v16 = vcombine.high %v3865_v23, %v3865_v23  ;;  %v7670_v12 = vadd.f32 %v3866_v19, %v7311_v17 }
 0x1c4   :  { %v4699_v5 = vadd.f32 %v4522_v9, %v7573_v0  ;;  %v4797_v36 = vadd.f32 %v7251_v50, %v4697_v13  ;;  %v4798_v21 = vadd.f32 %v7245_v37, %v4698_v39  ;;  %v7676_v10 = vadd.f32 %v3865_v23, %v8101_v20 }
 0x1c5   :  { %v7678_v32 = vmax.f32 %v5184_v11, %v5185_v1  ;;  %v7681_v59 = vadd.f32 %v3867_v16, %v8102_v63  ;;  %v4530_v2 = vrot.slane %v7498_v60, %v7115_v4  ;;  %v4537_v17 = vrot.slane %v4523_v18, %v7115_v4 }
 0x1c6   :  { %v5025_v27 = vcombine.low %v4796_v7, %v4797_v36  ;;  %v5039_v0 = vrot.slane %v4798_v21, %v7115_v4  ;;  %v4799_v31 = vadd.f32 %v7196_v42, %v4699_v5  ;;  %v3868_v22 = vcombine.high %v7538_v38, %v7538_v38 }
 0x1c7   :  { %v5187_v57 = vrot.slane %v7678_v32, 1  ;;  %v4538_v49 = vcombine.high %v4530_v2, %v4530_v2  ;;  %v4539_v15 = vcombine.high %v4537_v17, %v4537_v17  ;;  %v4700_v40 = vadd.f32 %v4530_v2, %v7595_v41 }
 0x1c8   :  { %v5032_v34 = vrot.slane %v5025_v27, %v7115_v4  ;;  %v4702_v60 = vadd.f32 %v4537_v17, %v7605_v8  ;;  %v3875_v18 = vrot.slane %v7538_v38, %v7115_v4  ;;  %v3882_v23 = vrot.slane %v3868_v22, %v7115_v4 }
 0x1c9   :  { %v4701_v11 = vadd.f32 %v4538_v49, %v7602_v35  ;;  %v4703_v55 = vadd.f32 %v4539_v15, %v7609_v53  ;;  %v4800_v19 = vadd.f32 %v7234_v46, %v4700_v40  ;;  %v4540_v44 = vcombine.high %v7528_v25, %v7528_v25 }
 0x1ca   :  { %v5040_v9 = vcombine.low %v5032_v34, %v5039_v0  ;;  %v4802_v41 = vadd.f32 %v7238_v24, %v4702_v60  ;;  %v3883_v13 = vcombine.high %v3875_v18, %v3875_v18  ;;  %v3884_v39 = vcombine.high %v3882_v23, %v3882_v23 }
 0x1cb   :  { %v4801_v8 = vadd.f32 %v7202_v45, %v4701_v11  ;;  %v5041_v7 = vcombine.low %v4799_v31, %v4800_v19  ;;  %v4006_v38 = vadd.f32 %v3875_v18, %v7324_v28  ;;  %v4008_v1 = vadd.f32 %v3882_v23, %v7331_v54 }
 0x1cc   :  { %v5189_v35 = vsel %vm5156_vm0, %v5040_v9, -inf  ;;  %v4007_v53 = vadd.f32 %v3883_v13, %v7329_v58  ;;  %v4009_v16 = vadd.f32 %v3884_v39, %v7339_v52  ;;  %v4547_v5 = vrot.slane %v7528_v25, %v7115_v4  ;;  %v8104_v9 = vld [vmem:[#allocation60_spill] sm:$0xff]  ;;  %v8105_v39 = vld [vmem:[#allocation22_spill] sm:$0xff] }
 0x1cd   :  { %v5190_v36 = vmax.f32 %v5024_v47, %v5189_v35  ;;  %v5042_v21 = vcombine.low %v4801_v8, %v4802_v41  ;;  %v5049_v20 = vrot.slane %v5041_v7, %v7115_v4  ;;  %v4554_v63 = vrot.slane %v4540_v44, %v7115_v4 }
 0x1ce   :  { %v4555_v2 = vcombine.high %v4547_v5, %v4547_v5  ;;  %v4704_v28 = vadd.f32 %v4547_v5, %v7633_v56  ;;  %v4803_v54 = vadd.f32 %v7211_v14, %v4703_v55  ;;  %v3885_v17 = vcombine.high %v7548_v48, %v7548_v48 }
 0x1cf   :  { %v5191_v58 = vrot.slane %v5190_v36, 4  ;;  %v5056_v52 = vrot.slane %v5042_v21, %v7115_v4  ;;  %v4556_v27 = vcombine.high %v4554_v63, %v4554_v63  ;;  %v4706_v25 = vadd.f32 %v4554_v63, %v7642_v51 }
 0x1d0   :  { %v4705_v47 = vadd.f32 %v4555_v2, %v7639_v29  ;;  %v4804_v0 = vadd.f32 %v7251_v50, %v4704_v28  ;;  %v3892_v31 = vrot.slane %v7548_v48, %v7115_v4  ;;  %v3899_v56 = vrot.slane %v3885_v17, %v7115_v4 }
 0x1d1   :  { %v7724_v22 = vmax.f32 %v5190_v36, %v5191_v58  ;;  %v5057_v49 = vcombine.low %v5049_v20, %v5056_v52  ;;  %v4707_v15 = vadd.f32 %v4556_v27, %v7646_v3  ;;  %v4806_v40 = vadd.f32 %v7196_v42, %v4706_v25  ;;  %v8103_v3 = vld [vmem:[#allocation58_spill] sm:$0xff] }
 0x1d2   :  { %v4805_v34 = vadd.f32 %v7245_v37, %v4705_v47  ;;  %v5058_v60 = vcombine.low %v4803_v54, %v4804_v0  ;;  %v3900_v51 = vcombine.high %v3892_v31, %v3892_v31  ;;  %v3901_v18 = vcombine.high %v3899_v56, %v3899_v56 }
 0x1d3   :  { %v5193_v29 = vrot.slane %v7724_v22, 2  ;;  %v4807_v23 = vadd.f32 %v7234_v46, %v4707_v15  ;;  %v4010_v48 = vadd.f32 %v3892_v31, %v7336_v33  ;;  %v4012_v11 = vadd.f32 %v3899_v56, %v7342_v6 }
 0x1d4   :  { %v5065_v55 = vrot.slane %v5058_v60, %v7115_v4  ;;  %v5072_v19 = vrot.slane %v4805_v34, %v7115_v4  ;;  %v4011_v44 = vadd.f32 %v3900_v51, %v8103_v3  ;;  %v4013_v41 = vadd.f32 %v3901_v18, %v8104_v9 }
 0x1d5   :  { %v5074_v13 = vcombine.low %v4806_v40, %v4807_v23  ;;  %v4557_v8 = vcombine.high %v8105_v39, %v8105_v39  ;;  %v4564_v7 = vrot.slane %v8105_v39, %v7115_v4  ;;  %v4574_v33 = vcombine.high %v7570_v62, %v7570_v62  ;;  %v7775_v39 = vld [vmem:[%s7819_s2] ss:$0 sm:$0xff]  ;;  %s5731_s2 = smov [#allocation2]  }
 0x1d6   :  { %v5073_v35 = vcombine.low %v5065_v55, %v5072_v19  ;;  %v4581_v6 = vrot.slane %v7570_v62, %v7115_v4  ;;  %v4591_v5 = vcombine.high %v7584_v30, %v7584_v30  ;;  %v4598_v36 = vrot.slane %v7584_v30, %v7115_v4  ;;  %s5281_s8 = sshll.u32 %s5731_s2, 4  ;;  %s5282_s8 = int_to_ptr.vmem [resolvable:$true] %s5281_s8 }
 0x1d7   :  { %v7750_v21 = vrot.slane %v5074_v13, %v7115_v4  ;;  %v4571_v20 = vrot.slane %v4557_v8, %v7115_v4  ;;  %v4572_v63 = vcombine.high %v4564_v7, %v4564_v7  ;;  %v4708_v2 = vadd.f32 %v4564_v7, %v7664_v26  ;;  %s5703_s9 = scalar_lea.vmem %s5282_s8, 128  ;;  %p5708_p1 = scmp.lt.s32.totalorder %s5282_s8, %s5282_s8 }
 0x1d8   :  { %v5197_v28 = vsel %vm5156_vm0, %v5073_v35, -inf  ;;  %v4588_v54 = vrot.slane %v4574_v33, %v7115_v4  ;;  %v4589_v17 = vcombine.high %v4581_v6, %v4581_v6  ;;  %v4712_v62 = vadd.f32 %v4581_v6, %v4006_v38  ;;  %p5704_p0 = scmp.ne.s32.totalorder %s5282_s8, %s5703_s9  ;;  %p5709_p2 = scmp.lt.s32.totalorder %s5703_s9, %s5703_s9 }
 0x1d9   :  { %v5198_v58 = vmax.f32 %v5057_v49, %v5197_v28  ;;  %v4573_v52 = vcombine.high %v4571_v20, %v4571_v20  ;;  %v4709_v27 = vadd.f32 %v4572_v63, %v7670_v12  ;;  %v4710_v30 = vadd.f32 %v4571_v20, %v7676_v10 }
 0x1da   :  { %v4808_v25 = vadd.f32 %v7202_v45, %v4708_v2  ;;  %v4590_v47 = vcombine.high %v4588_v54, %v4588_v54  ;;  %v4713_v0 = vadd.f32 %v4589_v17, %v4007_v53  ;;  %v4714_v31 = vadd.f32 %v4588_v54, %v4008_v1  ;;  %p5710_p3 = por %p5709_p2, %p5708_p1 }
 0x1db   :  { %v5199_v56 = vrot.slane %v5198_v58, 4  ;;  %v4711_v26 = vadd.f32 %v4573_v52, %v7681_v59  ;;  %v4809_v15 = vadd.f32 %v7238_v24, %v4709_v27  ;;  %v4810_v40 = vadd.f32 %v7211_v14, %v4710_v30 }
 0x1dc   :  { %v4715_v34 = vadd.f32 %v4590_v47, %v4009_v16  ;;  %v4812_v38 = vadd.f32 %v7245_v37, %v4712_v62  ;;  %v4813_v49 = vadd.f32 %v7196_v42, %v4713_v0  ;;  %v4814_v12 = vadd.f32 %v7234_v46, %v4714_v31  ;;  %p5711_p4 = pnand %p5710_p3, %p5704_p0 }
 0x1dd   :  { %v5200_v10 = vmax.f32 %v5198_v58, %v5199_v56  ;;  %v4811_v60 = vadd.f32 %v7251_v50, %v4711_v26  ;;  %v5075_v51 = vcombine.low %v4808_v25, %v4809_v15  ;;  %v4605_v1 = vrot.slane %v4591_v5, %v7115_v4 }
 0x1de   :  { %v5105_v53 = vrot.slane %v4812_v38, %v7115_v4  ;;  %v5107_v59 = vcombine.low %v4813_v49, %v4814_v12  ;;  %v4606_v18 = vcombine.high %v4598_v36, %v4598_v36  ;;  %v4716_v23 = vadd.f32 %v4598_v36, %v4010_v48  ;;  %v8106_v36 = vld [vmem:[#allocation35_spill] sm:$0xff] }
 0x1df   :  { %v5089_v55 = vrot.slane %v5075_v51, %v7115_v4  ;;  %v5091_v16 = vcombine.low %v4810_v40, %v4811_v60  ;;  %v4607_v19 = vcombine.high %v4605_v1, %v4605_v1  ;;  %v4718_v3 = vadd.f32 %v4605_v1, %v4012_v11 }
 0x1e0   :  { %v5115_v42 = vrot.slane %v5107_v59, %v7115_v4  ;;  %v4717_v9 = vadd.f32 %v4606_v18, %v4011_v44  ;;  %v4815_v46 = vadd.f32 %v7202_v45, %v4715_v34  ;;  %v4816_v13 = vadd.f32 %v7238_v24, %v4716_v23 }
 0x1e1   :  { %v5090_v48 = vcombine.low %v7750_v21, %v5089_v55  ;;  %v5098_v8 = vrot.slane %v5091_v16, %v7115_v4  ;;  %v4719_v7 = vadd.f32 %v4607_v19, %v4013_v41  ;;  %v4818_v11 = vadd.f32 %v7251_v50, %v4718_v3 }
 0x1e2   :  { %v4817_v33 = vadd.f32 %v7211_v14, %v4717_v9  ;;  %v5108_v44 = vcombine.low %v4815_v46, %v4816_v13  ;;  %v5188_v45 = vmax.f32 %v7678_v32, %v5187_v57  ;;  %v5194_v24 = vmax.f32 %v7724_v22, %v5193_v29 }
 0x1e3   :  { %v5106_v35 = vcombine.low %v5098_v8, %v5105_v53  ;;  %v4819_v6 = vadd.f32 %v7245_v37, %v4719_v7  ;;  %v5201_v5 = vrot.slane %v5200_v10, 2  ;;  %v5228_v41 = vadd.f32 %v7775_v39, %v8106_v36 }
 0x1e4   :  { %v5122_v50 = vrot.slane %v5108_v44, %v7115_v4  ;;  %v5124_v21 = vcombine.low %v4817_v33, %v4818_v11  ;;  %v5195_v14 = vrot.slane %v5194_v24, 1  ;;  %v5229_v20 = vadd.f32 %v7775_v39, %v7577_v61 }
 0x1e5   :  { %v5205_v32 = vsel %vm5156_vm0, %v5106_v35, -inf  ;;  %v5138_v57 = vrot.slane %v4819_v6, %v7115_v4  ;;  %v5202_v63 = vmax.f32 %v5200_v10, %v5201_v5  ;;  %v5230_v22 = vadd.f32 %v7775_v39, %v7635_v43 }
 0x1e6   :  { %v5206_v37 = vmax.f32 %v5090_v48, %v5205_v32  ;;  %v5123_v29 = vcombine.low %v5115_v42, %v5122_v50  ;;  %v5131_v2 = vrot.slane %v5124_v21, %v7115_v4  ;;  %v5196_v28 = vmax.f32 %v5194_v24, %v5195_v14 }
 0x1e7   :  { %v5203_v54 = vrot.slane %v5202_v63, 1  ;;  %v5231_v17 = vadd.f32 %v7775_v39, %v5188_v45  ;;  %v5236_v62 = vmax.f32 %v5228_v41, 0.0  ;;  %v5237_v58 = vmax.f32 %v5229_v20, 0.0 }
 0x1e8   :  { %v5207_v52 = vrot.slane %v5206_v37, 4  ;;  %v5139_v61 = vcombine.low %v5131_v2, %v5138_v57  ;;  %v5232_v27 = vadd.f32 %v7775_v39, %v5196_v28  ;;  %v5238_v30 = vmax.f32 %v5230_v22, 0.0 }
 0x1e9   :  { %v5204_v25 = vmax.f32 %v5202_v63, %v5203_v54  ;;  %v5239_v47 = vmax.f32 %v5231_v17, 0.0  ;;  %v5252_v0 = vrot.slane %v5237_v58, 7 }
 0x1ea   :  { %v5208_v43 = vmax.f32 %v5206_v37, %v5207_v52  ;;  %v5213_v31 = vsel %vm5156_vm0, %v5139_v61, -inf  ;;  %v5240_v56 = vmax.f32 %v5232_v27, 0.0  ;;  %v5255_v4 = vrot.slane %v5238_v30, 6 }
 0x1eb   :  { %v5214_v26 = vmax.f32 %v5123_v29, %v5213_v31  ;;  %v5233_v15 = vadd.f32 %v7775_v39, %v5204_v25  ;;  %v5254_v40 = vsel %vm5253_vm2, %v5252_v0, %v5236_v62  ;;  %v5258_v34 = vrot.slane %v5239_v47, 5 }
 0x1ec   :  { %v5209_v38 = vrot.slane %v5208_v43, 2  ;;  %v5257_v49 = vsel %vm5256_vm3, %v5255_v4, %v5254_v40  ;;  %v5261_v12 = vrot.slane %v5240_v56, 4 }
 0x1ed   :  { %v5215_v10 = vrot.slane %v5214_v26, 4  ;;  %v5241_v60 = vmax.f32 %v5233_v15, 0.0  ;;  %v5260_v51 = vsel %vm5259_vm4, %v5258_v34, %v5257_v49 }
 0x1ee   :  { %v5210_v1 = vmax.f32 %v5208_v43, %v5209_v38  ;;  %v5263_v53 = vsel %vm5262_vm5, %v5261_v12, %v5260_v51 }
 0x1ef   :  { %v5216_v59 = vmax.f32 %v5214_v26, %v5215_v10  ;;  %v5264_v18 = vrot.slane %v5241_v60, 3 }
 0x1f0   :  { %v5211_v23 = vrot.slane %v5210_v1, 1 }
 0x1f1   :  { %v5217_v55 = vrot.slane %v5216_v59, 2  ;;  %v5266_v16 = vsel %vm5265_vm6, %v5264_v18, %v5263_v53 }
 0x1f2   :  { %v5212_v19 = vmax.f32 %v5210_v1, %v5211_v23 }
 0x1f3   :  { %v5218_v3 = vmax.f32 %v5216_v59, %v5217_v55 }
 0x1f4   :  { %v5234_v42 = vadd.f32 %v7775_v39, %v5212_v19 }
 0x1f5   :  { %v5219_v9 = vrot.slane %v5218_v3, 1 }
 0x1f6   :  { %v5242_v46 = vmax.f32 %v5234_v42, 0.0 }
 0x1f7   :  { %v5220_v13 = vmax.f32 %v5218_v3, %v5219_v9 }
 0x1f8   :  { %v5267_v48 = vrot.slane %v5242_v46, 2 }
 0x1f9   :  { %v5235_v8 = vadd.f32 %v7775_v39, %v5220_v13 }
 0x1fa   :  { %v5269_v7 = vsel %vm5268_vm7, %v5267_v48, %v5266_v16 }
 0x1fb   :  { %v5243_v11 = vmax.f32 %v5235_v8, 0.0 }
 0x1fd   :  { %v5270_v33 = vrot.slane %v5243_v11, 1 }
 0x1ff   :  { %v5272_v44 = vsel %vm5271_vm8, %v5270_v33, %v5269_v7 }
 0x200   :  { %5274 = vst [vmem:[#allocation2] sm:$0xff] %v5272_v44 }
 0x201   :  { %5714 = shalt.err (!%p5711_p4)
}
 0x202   :  { %s5715_s12 = scalar_lea.hbm %s7821_s4, 128 }
 0x203   :  { %p5716_p5 = scmp.ne.s32.totalorder %s7821_s4, %s5715_s12  ;;  %p5719_p6 = scmp.lt.u32.totalorder %s5715_s12, %s7821_s4 }
 0x205   :  { %p5721_p7 = pnand %p5719_p6, %p5716_p5 }
 0x207   :  { %5724 = shalt.err (!%p5721_p7)
}
 0x208   :  { %5284 = dma.vmem_to_hbm [thread:$0]  %s5282_s8, 128, %s7821_s4, [#allocation3]  }
 0x209   :  { %5725 = dma.done.wait [#allocation3], 128  }
 0x20a   :  { %5726 = vsyncadd [#allocation3], 4294967168 }
 0x20b   :  { %5288 = vsyncpa [#allocation3], 1 }

</bundles_post_ra>
